<compile_context>
chip_gen: v7x
topology: tpu7x:2x2x1
jax: 0.10.0
libtpu: 0.0.40
codegen_flags: <defaults>
</compile_context>

<pallas_src>
import functools

import jax
import jax.numpy as jnp
from jax import lax
from jax.experimental import pallas as pl
from jax.experimental.pallas import tpu as pltpu

RNN_SIZE = 64        # rnn_size in the PyTorch module
NUM_LAYERS = 2       # num_layers (implemented explicitly as two stacked cells)
BN_EPS = 1e-5
SUBLANE = 8
LANE = 128


def _round_up(v, m):
    return (v + m - 1) // m * m


def _lstm_classifier_kernel(
    x_ref,       # ((S+1)*BT, F)  time-major within this batch tile (last step is zero pad)
    len_ref,     # (BT, 1)        int32 sequence lengths (0 for padded rows)
    wih1_ref,    # (F, 4H)        layer-1 input weights   (gate order i,f,o,g)
    b1_ref,      # (1, 4H)        layer-1 bias (ih+hh)
    wblk_ref,    # (2H, 8H)       block weight [[Whh1, Wih2], [0, Whh2]]
    b2_ref,      # (1, 4H)        layer-2 bias (ih+hh)
    wfc1_ref,    # (H, 128)       classifier linear 1
    bfc1_ref,    # (1, 128)
    bns_ref,     # (1, 128)       folded BatchNorm scale
    bnb_ref,     # (1, 128)       folded BatchNorm shift
    wfc2_ref,    # (128, CP)      classifier linear 2 (classes padded to CP lanes)
    bfc2_ref,    # (1, CP)
    out_ref,     # (BT, CP)       padded logits for this batch tile
    xproj_ref,   # scratch ((S+1)*BT, 4H) f32
    *,
    seq_len, batch_tile, hidden,
):
    S, BT, H = seq_len, batch_tile, hidden

    # ---- phase 1: non-recurrent input projection for all S+1 timesteps (one batched matmul)
    xproj_ref[...] = (
        jnp.dot(x_ref[...], wih1_ref[...], preferred_element_type=jnp.float32)
        + b1_ref[...]
    )

    # loop-invariant hoists (small: a couple of vregs, not the big weight tensors)
    lm1 = len_ref[...] - 1                                     # (BT, 1) int32
    b2b = jnp.broadcast_to(b2_ref[...], (BT, 4 * H))           # (BT, 4H)

    def gates(g):
        # gate columns are (i, f, o, g): sigmoid on the contiguous first 3H lanes,
        # tanh on the last H lanes.
        s = jax.nn.sigmoid(g[:, : 3 * H])
        return s[:, :H], s[:, H:2 * H], s[:, 2 * H:3 * H], jnp.tanh(g[:, 3 * H:])

    # ---- layer-1 step 0 (h1_prev = c1_prev = 0 -> preactivation is just xproj[0]) ----
    i0, f0, o0, g0 = gates(xproj_ref[pl.ds(0, BT), :])
    c1 = i0 * g0
    h1 = o0 * jnp.tanh(c1)
    zH = jnp.zeros((BT, H), jnp.float32)
    hh = jnp.concatenate((h1, zH), axis=-1)                    # [h1[0], h2[-1]=0]

    # ---- phase 2: retimed recurrent loop — one MXU push per timestep ----
    def step(t, carry):
        hh, c1, c2, last = carry

        # [h1[t], h2[t-1]] @ [[Whh1, Wih2], [0, Whh2]]  (weights streamed from VMEM refs)
        m = jnp.dot(hh, wblk_ref[...], preferred_element_type=jnp.float32)

        # layer 2, step t
        g2 = m[:, 4 * H:] + b2b
        i2, f2, o2, gg2 = gates(g2)
        c2 = f2 * c2 + i2 * gg2
        h2 = o2 * jnp.tanh(c2)

        # emulate pack_padded_sequence: keep top-layer output at t = length - 1
        last = jnp.where(lm1 == t, h2, last)

        # layer 1, step t+1 (final iteration reads the padded xproj[S] slot; result discarded)
        off = pl.multiple_of((t + 1) * BT, BT)
        g1 = xproj_ref[pl.ds(off, BT), :] + m[:, : 4 * H]
        i1, f1, o1, gg1 = gates(g1)
        c1 = f1 * c1 + i1 * gg1
        h1n = o1 * jnp.tanh(c1)

        return jnp.concatenate((h1n, h2), axis=-1), c1, c2, last

    _, _, _, last = lax.fori_loop(0, S, step, (hh, c1, zH, zH), unroll=min(S, 8))

    # ---- phase 3: classifier head ----
    # TODO(synk): dropout layers are identity (eval mode); training-mode dropout not implemented.
    z = jnp.dot(last, wfc1_ref[...], preferred_element_type=jnp.float32) + bfc1_ref[...]
    z = z * bns_ref[...] + bnb_ref[...]                        # BatchNorm1d (eval, folded)
    z = jnp.maximum(z, 0.0)                                    # ReLU
    out_ref[...] = (
        jnp.dot(z, wfc2_ref[...], preferred_element_type=jnp.float32) + bfc2_ref[...]
    )


def genre_classifier_forward(x, lengths, p, *, batch_tile=None):
    """x: [B, S, F] float32 (batch-first, like the PyTorch module), lengths: [B] int32.

    Precondition (same as pack_padded_sequence): 1 <= lengths[b] <= S.
    batch_tile: rows per grid step. Default = whole (padded) batch, i.e. grid=(1,).
    On v7x pass e.g. batch_tile = padded_batch // 2 to shard the batch across both TCs.
    """
    B, S, F = x.shape
    H = RNN_SIZE
    C = p["wfc2_t"].shape[1]

    if batch_tile is None:
        BT = _round_up(max(B, SUBLANE), SUBLANE)     # single tile -> no extra serialization
    else:
        BT = _round_up(max(batch_tile, SUBLANE), SUBLANE)
    BP = _round_up(max(B, BT), BT)                   # padded batch, divisible by BT
    nbt = BP // BT
    CP = _round_up(max(C, LANE), LANE)               # lane-dense output

    # --- wrapper-side data prep (layout plumbing, not compute hoisting) ---
    # pad batch, add one zero timestep (feeds the retimed final layer-1 step), then lay out
    # as (batch_tile, time, within-tile-batch) so each grid step's block is contiguous.
    x_p = jnp.zeros((BP, S + 1, F), jnp.float32).at[:B, :S].set(x)
    x_r = (x_p.reshape(nbt, BT, S + 1, F)
               .transpose(0, 2, 1, 3)
               .reshape(nbt * (S + 1) * BT, F))
    lens = jnp.zeros((BP, 1), jnp.int32).at[:B, 0].set(lengths.astype(jnp.int32))

    # gate reorder (i,f,g,o) -> (i,f,o,g), applied consistently to weights and biases
    perm = jnp.concatenate([
        jnp.arange(0, H), jnp.arange(H, 2 * H),
        jnp.arange(3 * H, 4 * H), jnp.arange(2 * H, 3 * H)])
    wih1 = p["wih1_t"][:, perm]
    whh1 = p["whh1_t"][:, perm]
    wih2 = p["wih2_t"][:, perm]
    whh2 = p["whh2_t"][:, perm]
    b1 = p["b1"][:, perm]
    b2 = p["b2"][:, perm]

    # retimed block weight: [h1[t], h2[t-1]] @ [[Whh1, Wih2], [0, Whh2]]
    w_blk = jnp.concatenate([
        jnp.concatenate([whh1, wih2], axis=1),
        jnp.concatenate([jnp.zeros((H, 4 * H), jnp.float32), whh2], axis=1),
    ], axis=0)                                                   # (2H, 8H)

    # pad final-linear columns so the single output store is lane-dense
    wfc2 = jnp.zeros((128, CP), jnp.float32).at[:, :C].set(p["wfc2_t"])
    bfc2 = jnp.zeros((1, CP), jnp.float32).at[:, :C].set(p["bfc2"])

    kernel = functools.partial(
        _lstm_classifier_kernel, seq_len=S, batch_tile=BT, hidden=H)

    def full(shape):
        return pl.BlockSpec(shape, lambda i, _n=len(shape): (0,) * _n)

    grid_spec = pltpu.PrefetchScalarGridSpec(
        num_scalar_prefetch=0,
        grid=(nbt,),                                  # batch tiles (parallel across v7x TCs)
        in_specs=[
            pl.BlockSpec(((S + 1) * BT, F), lambda i: (i, 0)),   # x (this batch tile)
            pl.BlockSpec((BT, 1), lambda i: (i, 0)),             # lengths
            full((F, 4 * H)), full((1, 4 * H)),
            full((2 * H, 8 * H)), full((1, 4 * H)),
            full((H, 128)), full((1, 128)),
            full((1, 128)), full((1, 128)),
            full((128, CP)), full((1, CP)),
        ],
        out_specs=pl.BlockSpec((BT, CP), lambda i: (i, 0)),
        scratch_shapes=[pltpu.VMEM(((S + 1) * BT, 4 * H), jnp.float32)],
    )

    # explicit scoped-VMEM limit (defaults are 16/32 MiB); capped at v7x's 64 MiB physical.
    est = 4 * (2 * (S + 1) * BT * F + (S + 1) * BT * 4 * H
               + F * 4 * H + 2 * H * 8 * H + H * 128 + 128 * CP
               + 2 * BT * CP + 16 * 4 * H + 8 * 128 + 2 * CP)
    vmem_limit = int(min(64 * 1024 * 1024, max(32 * 1024 * 1024, 2 * est)))

    out = pl.pallas_call(
        kernel,
        out_shape=jax.ShapeDtypeStruct((BP, CP), jnp.float32),
        grid_spec=grid_spec,
        compiler_params=pltpu.CompilerParams(
            dimension_semantics=("parallel",),
            vmem_limit_bytes=vmem_limit),
    )(
        x_r, lens,
        wih1, b1,
        w_blk, b2,
        p["wfc1_t"], p["bfc1"],
        p["bn_scale"], p["bn_shift"],
        wfc2, bfc2,
    )
    return out[:B, :C]


def init_params(key, input_dim, num_classes):
    """Deterministic synthetic parameters matching the PyTorch shapes (gate order i,f,g,o)."""
    H = RNN_SIZE
    ks = jax.random.split(key, 20)
    u = lambda k, shape, b: jax.random.uniform(k, shape, jnp.float32, -b, b)
    kb = 1.0 / jnp.sqrt(float(H))

    # nn.LSTM layer 0: weight_ih_l0 (4H, F), weight_hh_l0 (4H, H), biases (4H,)
    wih1 = u(ks[0], (4 * H, input_dim), kb)
    whh1 = u(ks[1], (4 * H, H), kb)
    b1 = u(ks[2], (4 * H,), kb) + u(ks[3], (4 * H,), kb)        # bias_ih + bias_hh
    # layer 1: weight_ih_l1 (4H, H)
    wih2 = u(ks[4], (4 * H, H), kb)
    whh2 = u(ks[5], (4 * H, H), kb)
    b2 = u(ks[6], (4 * H,), kb) + u(ks[7], (4 * H,), kb)

    # classifier: Linear(H, 128), BatchNorm1d(128), Linear(128, C)
    wfc1 = u(ks[8], (128, H), 1.0 / jnp.sqrt(float(H)))
    bfc1 = u(ks[9], (128,), 1.0 / jnp.sqrt(float(H)))
    gamma = 1.0 + 0.1 * jax.random.normal(ks[10], (128,), jnp.float32)
    beta = 0.1 * jax.random.normal(ks[11], (128,), jnp.float32)
    run_mean = 0.1 * jax.random.normal(ks[12], (128,), jnp.float32)
    run_var = jax.random.uniform(ks[13], (128,), jnp.float32, 0.5, 1.5)
    wfc2 = u(ks[14], (num_classes, 128), 1.0 / jnp.sqrt(128.0))
    bfc2 = u(ks[15], (num_classes,), 1.0 / jnp.sqrt(128.0))

    bn_scale = gamma / jnp.sqrt(run_var + BN_EPS)
    bn_shift = beta - run_mean * bn_scale

    return {
        "wih1_t": wih1.T, "whh1_t": whh1.T, "b1": b1.reshape(1, -1),
        "wih2_t": wih2.T, "whh2_t": whh2.T, "b2": b2.reshape(1, -1),
        "wfc1_t": wfc1.T, "bfc1": bfc1.reshape(1, -1),
        "bn_scale": bn_scale.reshape(1, -1), "bn_shift": bn_shift.reshape(1, -1),
        "wfc2_t": wfc2.T, "bfc2": bfc2.reshape(1, -1),
    }


def reference_forward(x, lengths, p):
    """Pure-JAX reference of the (eval-mode) PyTorch forward (gate order i,f,g,o)."""
    B, S, F = x.shape
    H = RNN_SIZE

    def cell(xt, h, c, wih_t, whh_t, b):
        g = xt @ wih_t + h @ whh_t + b
        i = jax.nn.sigmoid(g[:, :H])
        f = jax.nn.sigmoid(g[:, H:2 * H])
        gg = jnp.tanh(g[:, 2 * H:3 * H])
        o = jax.nn.sigmoid(g[:, 3 * H:])
        c = f * c + i * gg
        return o * jnp.tanh(c), c

    h1 = c1 = h2 = c2 = jnp.zeros((B, H), jnp.float32)
    outs = []
    for t in range(S):
        h1, c1 = cell(x[:, t], h1, c1, p["wih1_t"], p["whh1_t"], p["b1"])
        h2, c2 = cell(h1, h2, c2, p["wih2_t"], p["whh2_t"], p["b2"])
        outs.append(h2)
    out = jnp.stack(outs, axis=1)                               # (B, S, H)
    last = out[jnp.arange(B), lengths - 1]                      # last unpadded step
    z = last @ p["wfc1_t"] + p["bfc1"]
    z = z * p["bn_scale"] + p["bn_shift"]
    z = jnp.maximum(z, 0.0)
    return z @ p["wfc2_t"] + p["bfc2"]


if __name__ == "__main__":
    B, S, F = 2, 8, 16            # batch, seq len, input_dim
    NUM_CLASSES = 10

    key = jax.random.PRNGKey(0)
    k_x, k_p = jax.random.split(key)
    x = jax.random.normal(k_x, (B, S, F), jnp.float32)
    lengths = jnp.array([8, 5], dtype=jnp.int32)
    params = init_params(k_p, F, NUM_CLASSES)

    logits = genre_classifier_forward(x, lengths, params)
    logits = jax.block_until_ready(logits)

    ref = reference_forward(x, lengths, params)
    assert logits.shape == (B, NUM_CLASSES)
    assert jnp.allclose(logits, ref, atol=5e-3, rtol=5e-3), (logits, ref)

    print("KERNEL_OK")
</pallas_src>

<mosaic_0001>
module attributes {stable_mosaic.version = 11 : i64} {
  func.func @_lstm_classifier_kernel(%arg0: i32, %arg1: memref<72x16xf32, #tpu.memory_space<vmem>>, %arg2: memref<8x1xi32, #tpu.memory_space<vmem>>, %arg3: memref<16x256xf32, #tpu.memory_space<vmem>>, %arg4: memref<1x256xf32, #tpu.memory_space<vmem>>, %arg5: memref<128x512xf32, #tpu.memory_space<vmem>>, %arg6: memref<1x256xf32, #tpu.memory_space<vmem>>, %arg7: memref<64x128xf32, #tpu.memory_space<vmem>>, %arg8: memref<1x128xf32, #tpu.memory_space<vmem>>, %arg9: memref<1x128xf32, #tpu.memory_space<vmem>>, %arg10: memref<1x128xf32, #tpu.memory_space<vmem>>, %arg11: memref<128x128xf32, #tpu.memory_space<vmem>>, %arg12: memref<1x128xf32, #tpu.memory_space<vmem>>, %arg13: memref<8x128xf32, #tpu.memory_space<vmem>>, %arg14: memref<72x256xf32, #tpu.memory_space<vmem>>) attributes {dimension_semantics = [#tpu.dimension_semantics<parallel>], iteration_bounds = array<i64: 1>, scalar_prefetch = 0 : i64, scratch_operands = 1 : i64, tpu.core_type = #tpu.core_type<tc>, window_params = [{transform_indices = @transform_0, window_bounds = array<i64: 72, 16>}, {transform_indices = @transform_1, window_bounds = array<i64: 8, 1>}, {pipeline_mode = #tpu.pipeline_mode<synchronous>, transform_indices = @transform_2, window_bounds = array<i64: 16, 256>}, {pipeline_mode = #tpu.pipeline_mode<synchronous>, transform_indices = @transform_3, window_bounds = array<i64: 1, 256>}, {pipeline_mode = #tpu.pipeline_mode<synchronous>, transform_indices = @transform_4, window_bounds = array<i64: 128, 512>}, {pipeline_mode = #tpu.pipeline_mode<synchronous>, transform_indices = @transform_5, window_bounds = array<i64: 1, 256>}, {pipeline_mode = #tpu.pipeline_mode<synchronous>, transform_indices = @transform_6, window_bounds = array<i64: 64, 128>}, {pipeline_mode = #tpu.pipeline_mode<synchronous>, transform_indices = @transform_7, window_bounds = array<i64: 1, 128>}, {pipeline_mode = #tpu.pipeline_mode<synchronous>, transform_indices = @transform_8, window_bounds = array<i64: 1, 128>}, {pipeline_mode = #tpu.pipeline_mode<synchronous>, transform_indices = @transform_9, window_bounds = array<i64: 1, 128>}, {pipeline_mode = #tpu.pipeline_mode<synchronous>, transform_indices = @transform_10, window_bounds = array<i64: 128, 128>}, {pipeline_mode = #tpu.pipeline_mode<synchronous>, transform_indices = @transform_11, window_bounds = array<i64: 1, 128>}, {transform_indices = @transform_12, window_bounds = array<i64: 8, 128>}]} {
    %c0 = arith.constant 0 : index
    %c0_0 = arith.constant 0 : index
    %0 = vector.load %arg1[%c0, %c0_0] : memref<72x16xf32, #tpu.memory_space<vmem>>, vector<72x16xf32>
    %c0_1 = arith.constant 0 : index
    %c0_2 = arith.constant 0 : index
    %1 = vector.load %arg3[%c0_1, %c0_2] : memref<16x256xf32, #tpu.memory_space<vmem>>, vector<16x256xf32>
    %cst = arith.constant dense<0.000000e+00> : vector<72x256xf32>
    %2 = tpu.matmul %0, %1, %cst {dimension_numbers = #tpu.dot_dimension_numbers<[1], [0], [0], [1], [0, 0, 1, 1], [], []>} : vector<72x16xf32>, vector<16x256xf32>, vector<72x256xf32> -> vector<72x256xf32>
    %c0_3 = arith.constant 0 : index
    %c0_4 = arith.constant 0 : index
    %3 = vector.load %arg4[%c0_3, %c0_4] : memref<1x256xf32, #tpu.memory_space<vmem>>, vector<1x256xf32>
    %4 = vector.broadcast %3 : vector<1x256xf32> to vector<72x256xf32>
    %5 = arith.addf %2, %4 : vector<72x256xf32>
    %c0_5 = arith.constant 0 : index
    %c0_6 = arith.constant 0 : index
    %6 = vector.load %arg14[%c0_5, %c0_6] : memref<72x256xf32, #tpu.memory_space<vmem>>, vector<72x256xf32>
    tpu.vector_store %arg14[%c0_5, %c0_6], %5 {strides = array<i32>} : memref<72x256xf32, #tpu.memory_space<vmem>>, vector<72x256xf32>,
    %c0_7 = arith.constant 0 : index
    %c0_8 = arith.constant 0 : index
    %7 = vector.load %arg2[%c0_7, %c0_8] : memref<8x1xi32, #tpu.memory_space<vmem>>, vector<8x1xi32>
    %c1_i32 = arith.constant 1 : i32
    %8 = vector.broadcast %c1_i32 : i32 to vector<8x1xi32>
    %9 = arith.subi %7, %8 : vector<8x1xi32>
    %c0_9 = arith.constant 0 : index
    %c0_10 = arith.constant 0 : index
    %10 = vector.load %arg6[%c0_9, %c0_10] : memref<1x256xf32, #tpu.memory_space<vmem>>, vector<1x256xf32>
    %11 = vector.shape_cast %10 : vector<1x256xf32> to vector<1x256xf32>
    %12 = vector.broadcast %11 : vector<1x256xf32> to vector<8x256xf32>
    %c0_11 = arith.constant 0 : index
    %c0_12 = arith.constant 0 : index
    %13 = vector.load %arg14[%c0_11, %c0_12] : memref<72x256xf32, #tpu.memory_space<vmem>>, vector<8x256xf32>
    %14 = vector.extract_strided_slice %13 {offsets = [0, 0], sizes = [8, 192], strides = [1, 1]} : vector<8x256xf32> to vector<8x192xf32>
    %15 = arith.negf %14 : vector<8x192xf32>
    %16 = math.exp %15 : vector<8x192xf32>
    %cst_13 = arith.constant 1.000000e+00 : f32
    %17 = vector.broadcast %cst_13 : f32 to vector<8x192xf32>
    %18 = arith.addf %17, %16 : vector<8x192xf32>
    %19 = arith.divf %17, %18 : vector<8x192xf32>
    %20 = vector.extract_strided_slice %19 {offsets = [0, 0], sizes = [8, 64], strides = [1, 1]} : vector<8x192xf32> to vector<8x64xf32>
    %21 = vector.extract_strided_slice %19 {offsets = [0, 128], sizes = [8, 64], strides = [1, 1]} : vector<8x192xf32> to vector<8x64xf32>
    %22 = vector.extract_strided_slice %13 {offsets = [0, 192], sizes = [8, 64], strides = [1, 1]} : vector<8x256xf32> to vector<8x64xf32>
    %23 = math.tanh %22 : vector<8x64xf32>
    %24 = arith.mulf %20, %23 : vector<8x64xf32>
    %25 = math.tanh %24 : vector<8x64xf32>
    %26 = arith.mulf %21, %25 : vector<8x64xf32>
    %cst_14 = arith.constant 0.000000e+00 : f32
    %27 = vector.broadcast %cst_14 : f32 to vector<8x64xf32>
    %28 = tpu.concatenate %26, %27 in 1 : vector<8x64xf32>, vector<8x64xf32> -> vector<8x128xf32>
    %c0_i32 = arith.constant 0 : i32
    %c0_15 = arith.constant 0 : index
    %c0_16 = arith.constant 0 : index
    %29 = vector.load %arg5[%c0_15, %c0_16] : memref<128x512xf32, #tpu.memory_space<vmem>>, vector<128x512xf32>
    %cst_17 = arith.constant dense<0.000000e+00> : vector<8x512xf32>
    %30 = tpu.matmul %28, %29, %cst_17 {dimension_numbers = #tpu.dot_dimension_numbers<[1], [0], [0], [1], [0, 0, 1, 1], [], []>} : vector<8x128xf32>, vector<128x512xf32>, vector<8x512xf32> -> vector<8x512xf32>
    %31 = vector.extract_strided_slice %30 {offsets = [0, 256], sizes = [8, 256], strides = [1, 1]} : vector<8x512xf32> to vector<8x256xf32>
    %32 = arith.addf %31, %12 : vector<8x256xf32>
    %33 = vector.extract_strided_slice %32 {offsets = [0, 0], sizes = [8, 192], strides = [1, 1]} : vector<8x256xf32> to vector<8x192xf32>
    %34 = arith.negf %33 : vector<8x192xf32>
    %35 = math.exp %34 : vector<8x192xf32>
    %cst_18 = arith.constant 1.000000e+00 : f32
    %36 = vector.broadcast %cst_18 : f32 to vector<8x192xf32>
    %37 = arith.addf %36, %35 : vector<8x192xf32>
    %38 = arith.divf %36, %37 : vector<8x192xf32>
    %39 = vector.extract_strided_slice %38 {offsets = [0, 0], sizes = [8, 64], strides = [1, 1]} : vector<8x192xf32> to vector<8x64xf32>
    %40 = vector.extract_strided_slice %38 {offsets = [0, 64], sizes = [8, 64], strides = [1, 1]} : vector<8x192xf32> to vector<8x64xf32>
    %41 = vector.extract_strided_slice %38 {offsets = [0, 128], sizes = [8, 64], strides = [1, 1]} : vector<8x192xf32> to vector<8x64xf32>
    %42 = vector.extract_strided_slice %32 {offsets = [0, 192], sizes = [8, 64], strides = [1, 1]} : vector<8x256xf32> to vector<8x64xf32>
    %43 = math.tanh %42 : vector<8x64xf32>
    %44 = arith.mulf %40, %27 : vector<8x64xf32>
    %45 = arith.mulf %39, %43 : vector<8x64xf32>
    %46 = arith.addf %44, %45 : vector<8x64xf32>
    %47 = math.tanh %46 : vector<8x64xf32>
    %48 = arith.mulf %41, %47 : vector<8x64xf32>
    %49 = vector.broadcast %c0_i32 : i32 to vector<8x1xi32>
    %50 = arith.cmpi eq, %9, %49 : vector<8x1xi32>
    %51 = vector.shape_cast %50 : vector<8x1xi1> to vector<8x1xi1>
    %52 = vector.broadcast %51 : vector<8x1xi1> to vector<8x64xi1>
    %53 = arith.select %52, %48, %27 : vector<8x64xi1>, vector<8x64xf32>
    %c1_i32_19 = arith.constant 1 : i32
    %54 = arith.addi %c0_i32, %c1_i32_19 : i32
    %c8_i32 = arith.constant 8 : i32
    %55 = arith.muli %54, %c8_i32 : i32
    %56 = tpu.assume_multiple %55, 8 : i32
    %57 = arith.index_cast %56 : i32 to index
    %c0_20 = arith.constant 0 : index
    %58 = vector.load %arg14[%57, %c0_20] : memref<72x256xf32, #tpu.memory_space<vmem>>, vector<8x256xf32>
    %59 = vector.extract_strided_slice %30 {offsets = [0, 0], sizes = [8, 256], strides = [1, 1]} : vector<8x512xf32> to vector<8x256xf32>
    %60 = arith.addf %58, %59 : vector<8x256xf32>
    %61 = vector.extract_strided_slice %60 {offsets = [0, 0], sizes = [8, 192], strides = [1, 1]} : vector<8x256xf32> to vector<8x192xf32>
    %62 = arith.negf %61 : vector<8x192xf32>
    %63 = math.exp %62 : vector<8x192xf32>
    %cst_21 = arith.constant 1.000000e+00 : f32
    %64 = vector.broadcast %cst_21 : f32 to vector<8x192xf32>
    %65 = arith.addf %64, %63 : vector<8x192xf32>
    %66 = arith.divf %64, %65 : vector<8x192xf32>
    %67 = vector.extract_strided_slice %66 {offsets = [0, 0], sizes = [8, 64], strides = [1, 1]} : vector<8x192xf32> to vector<8x64xf32>
    %68 = vector.extract_strided_slice %66 {offsets = [0, 64], sizes = [8, 64], strides = [1, 1]} : vector<8x192xf32> to vector<8x64xf32>
    %69 = vector.extract_strided_slice %66 {offsets = [0, 128], sizes = [8, 64], strides = [1, 1]} : vector<8x192xf32> to vector<8x64xf32>
    %70 = vector.extract_strided_slice %60 {offsets = [0, 192], sizes = [8, 64], strides = [1, 1]} : vector<8x256xf32> to vector<8x64xf32>
    %71 = math.tanh %70 : vector<8x64xf32>
    %72 = arith.mulf %68, %24 : vector<8x64xf32>
    %73 = arith.mulf %67, %71 : vector<8x64xf32>
    %74 = arith.addf %72, %73 : vector<8x64xf32>
    %75 = math.tanh %74 : vector<8x64xf32>
    %76 = arith.mulf %69, %75 : vector<8x64xf32>
    %77 = tpu.concatenate %76, %48 in 1 : vector<8x64xf32>, vector<8x64xf32> -> vector<8x128xf32>
    %c1_i32_22 = arith.constant 1 : i32
    %c0_23 = arith.constant 0 : index
    %c0_24 = arith.constant 0 : index
    %78 = vector.load %arg5[%c0_23, %c0_24] : memref<128x512xf32, #tpu.memory_space<vmem>>, vector<128x512xf32>
    %cst_25 = arith.constant dense<0.000000e+00> : vector<8x512xf32>
    %79 = tpu.matmul %77, %78, %cst_25 {dimension_numbers = #tpu.dot_dimension_numbers<[1], [0], [0], [1], [0, 0, 1, 1], [], []>} : vector<8x128xf32>, vector<128x512xf32>, vector<8x512xf32> -> vector<8x512xf32>
    %80 = vector.extract_strided_slice %79 {offsets = [0, 256], sizes = [8, 256], strides = [1, 1]} : vector<8x512xf32> to vector<8x256xf32>
    %81 = arith.addf %80, %12 : vector<8x256xf32>
    %82 = vector.extract_strided_slice %81 {offsets = [0, 0], sizes = [8, 192], strides = [1, 1]} : vector<8x256xf32> to vector<8x192xf32>
    %83 = arith.negf %82 : vector<8x192xf32>
    %84 = math.exp %83 : vector<8x192xf32>
    %cst_26 = arith.constant 1.000000e+00 : f32
    %85 = vector.broadcast %cst_26 : f32 to vector<8x192xf32>
    %86 = arith.addf %85, %84 : vector<8x192xf32>
    %87 = arith.divf %85, %86 : vector<8x192xf32>
    %88 = vector.extract_strided_slice %87 {offsets = [0, 0], sizes = [8, 64], strides = [1, 1]} : vector<8x192xf32> to vector<8x64xf32>
    %89 = vector.extract_strided_slice %87 {offsets = [0, 64], sizes = [8, 64], strides = [1, 1]} : vector<8x192xf32> to vector<8x64xf32>
    %90 = vector.extract_strided_slice %87 {offsets = [0, 128], sizes = [8, 64], strides = [1, 1]} : vector<8x192xf32> to vector<8x64xf32>
    %91 = vector.extract_strided_slice %81 {offsets = [0, 192], sizes = [8, 64], strides = [1, 1]} : vector<8x256xf32> to vector<8x64xf32>
    %92 = math.tanh %91 : vector<8x64xf32>
    %93 = arith.mulf %89, %46 : vector<8x64xf32>
    %94 = arith.mulf %88, %92 : vector<8x64xf32>
    %95 = arith.addf %93, %94 : vector<8x64xf32>
    %96 = math.tanh %95 : vector<8x64xf32>
    %97 = arith.mulf %90, %96 : vector<8x64xf32>
    %98 = vector.broadcast %c1_i32_22 : i32 to vector<8x1xi32>
    %99 = arith.cmpi eq, %9, %98 : vector<8x1xi32>
    %100 = vector.shape_cast %99 : vector<8x1xi1> to vector<8x1xi1>
    %101 = vector.broadcast %100 : vector<8x1xi1> to vector<8x64xi1>
    %102 = arith.select %101, %97, %53 : vector<8x64xi1>, vector<8x64xf32>
    %c1_i32_27 = arith.constant 1 : i32
    %103 = arith.addi %c1_i32_22, %c1_i32_27 : i32
    %c8_i32_28 = arith.constant 8 : i32
    %104 = arith.muli %103, %c8_i32_28 : i32
    %105 = tpu.assume_multiple %104, 8 : i32
    %106 = arith.index_cast %105 : i32 to index
    %c0_29 = arith.constant 0 : index
    %107 = vector.load %arg14[%106, %c0_29] : memref<72x256xf32, #tpu.memory_space<vmem>>, vector<8x256xf32>
    %108 = vector.extract_strided_slice %79 {offsets = [0, 0], sizes = [8, 256], strides = [1, 1]} : vector<8x512xf32> to vector<8x256xf32>
    %109 = arith.addf %107, %108 : vector<8x256xf32>
    %110 = vector.extract_strided_slice %109 {offsets = [0, 0], sizes = [8, 192], strides = [1, 1]} : vector<8x256xf32> to vector<8x192xf32>
    %111 = arith.negf %110 : vector<8x192xf32>
    %112 = math.exp %111 : vector<8x192xf32>
    %cst_30 = arith.constant 1.000000e+00 : f32
    %113 = vector.broadcast %cst_30 : f32 to vector<8x192xf32>
    %114 = arith.addf %113, %112 : vector<8x192xf32>
    %115 = arith.divf %113, %114 : vector<8x192xf32>
    %116 = vector.extract_strided_slice %115 {offsets = [0, 0], sizes = [8, 64], strides = [1, 1]} : vector<8x192xf32> to vector<8x64xf32>
    %117 = vector.extract_strided_slice %115 {offsets = [0, 64], sizes = [8, 64], strides = [1, 1]} : vector<8x192xf32> to vector<8x64xf32>
    %118 = vector.extract_strided_slice %115 {offsets = [0, 128], sizes = [8, 64], strides = [1, 1]} : vector<8x192xf32> to vector<8x64xf32>
    %119 = vector.extract_strided_slice %109 {offsets = [0, 192], sizes = [8, 64], strides = [1, 1]} : vector<8x256xf32> to vector<8x64xf32>
    %120 = math.tanh %119 : vector<8x64xf32>
    %121 = arith.mulf %117, %74 : vector<8x64xf32>
    %122 = arith.mulf %116, %120 : vector<8x64xf32>
    %123 = arith.addf %121, %122 : vector<8x64xf32>
    %124 = math.tanh %123 : vector<8x64xf32>
    %125 = arith.mulf %118, %124 : vector<8x64xf32>
    %126 = tpu.concatenate %125, %97 in 1 : vector<8x64xf32>, vector<8x64xf32> -> vector<8x128xf32>
    %c2_i32 = arith.constant 2 : i32
    %c0_31 = arith.constant 0 : index
    %c0_32 = arith.constant 0 : index
    %127 = vector.load %arg5[%c0_31, %c0_32] : memref<128x512xf32, #tpu.memory_space<vmem>>, vector<128x512xf32>
    %cst_33 = arith.constant dense<0.000000e+00> : vector<8x512xf32>
    %128 = tpu.matmul %126, %127, %cst_33 {dimension_numbers = #tpu.dot_dimension_numbers<[1], [0], [0], [1], [0, 0, 1, 1], [], []>} : vector<8x128xf32>, vector<128x512xf32>, vector<8x512xf32> -> vector<8x512xf32>
    %129 = vector.extract_strided_slice %128 {offsets = [0, 256], sizes = [8, 256], strides = [1, 1]} : vector<8x512xf32> to vector<8x256xf32>
    %130 = arith.addf %129, %12 : vector<8x256xf32>
    %131 = vector.extract_strided_slice %130 {offsets = [0, 0], sizes = [8, 192], strides = [1, 1]} : vector<8x256xf32> to vector<8x192xf32>
    %132 = arith.negf %131 : vector<8x192xf32>
    %133 = math.exp %132 : vector<8x192xf32>
    %cst_34 = arith.constant 1.000000e+00 : f32
    %134 = vector.broadcast %cst_34 : f32 to vector<8x192xf32>
    %135 = arith.addf %134, %133 : vector<8x192xf32>
    %136 = arith.divf %134, %135 : vector<8x192xf32>
    %137 = vector.extract_strided_slice %136 {offsets = [0, 0], sizes = [8, 64], strides = [1, 1]} : vector<8x192xf32> to vector<8x64xf32>
    %138 = vector.extract_strided_slice %136 {offsets = [0, 64], sizes = [8, 64], strides = [1, 1]} : vector<8x192xf32> to vector<8x64xf32>
    %139 = vector.extract_strided_slice %136 {offsets = [0, 128], sizes = [8, 64], strides = [1, 1]} : vector<8x192xf32> to vector<8x64xf32>
    %140 = vector.extract_strided_slice %130 {offsets = [0, 192], sizes = [8, 64], strides = [1, 1]} : vector<8x256xf32> to vector<8x64xf32>
    %141 = math.tanh %140 : vector<8x64xf32>
    %142 = arith.mulf %138, %95 : vector<8x64xf32>
    %143 = arith.mulf %137, %141 : vector<8x64xf32>
    %144 = arith.addf %142, %143 : vector<8x64xf32>
    %145 = math.tanh %144 : vector<8x64xf32>
    %146 = arith.mulf %139, %145 : vector<8x64xf32>
    %147 = vector.broadcast %c2_i32 : i32 to vector<8x1xi32>
    %148 = arith.cmpi eq, %9, %147 : vector<8x1xi32>
    %149 = vector.shape_cast %148 : vector<8x1xi1> to vector<8x1xi1>
    %150 = vector.broadcast %149 : vector<8x1xi1> to vector<8x64xi1>
    %151 = arith.select %150, %146, %102 : vector<8x64xi1>, vector<8x64xf32>
    %c1_i32_35 = arith.constant 1 : i32
    %152 = arith.addi %c2_i32, %c1_i32_35 : i32
    %c8_i32_36 = arith.constant 8 : i32
    %153 = arith.muli %152, %c8_i32_36 : i32
    %154 = tpu.assume_multiple %153, 8 : i32
    %155 = arith.index_cast %154 : i32 to index
    %c0_37 = arith.constant 0 : index
    %156 = vector.load %arg14[%155, %c0_37] : memref<72x256xf32, #tpu.memory_space<vmem>>, vector<8x256xf32>
    %157 = vector.extract_strided_slice %128 {offsets = [0, 0], sizes = [8, 256], strides = [1, 1]} : vector<8x512xf32> to vector<8x256xf32>
    %158 = arith.addf %156, %157 : vector<8x256xf32>
    %159 = vector.extract_strided_slice %158 {offsets = [0, 0], sizes = [8, 192], strides = [1, 1]} : vector<8x256xf32> to vector<8x192xf32>
    %160 = arith.negf %159 : vector<8x192xf32>
    %161 = math.exp %160 : vector<8x192xf32>
    %cst_38 = arith.constant 1.000000e+00 : f32
    %162 = vector.broadcast %cst_38 : f32 to vector<8x192xf32>
    %163 = arith.addf %162, %161 : vector<8x192xf32>
    %164 = arith.divf %162, %163 : vector<8x192xf32>
    %165 = vector.extract_strided_slice %164 {offsets = [0, 0], sizes = [8, 64], strides = [1, 1]} : vector<8x192xf32> to vector<8x64xf32>
    %166 = vector.extract_strided_slice %164 {offsets = [0, 64], sizes = [8, 64], strides = [1, 1]} : vector<8x192xf32> to vector<8x64xf32>
    %167 = vector.extract_strided_slice %164 {offsets = [0, 128], sizes = [8, 64], strides = [1, 1]} : vector<8x192xf32> to vector<8x64xf32>
    %168 = vector.extract_strided_slice %158 {offsets = [0, 192], sizes = [8, 64], strides = [1, 1]} : vector<8x256xf32> to vector<8x64xf32>
    %169 = math.tanh %168 : vector<8x64xf32>
    %170 = arith.mulf %166, %123 : vector<8x64xf32>
    %171 = arith.mulf %165, %169 : vector<8x64xf32>
    %172 = arith.addf %170, %171 : vector<8x64xf32>
    %173 = math.tanh %172 : vector<8x64xf32>
    %174 = arith.mulf %167, %173 : vector<8x64xf32>
    %175 = tpu.concatenate %174, %146 in 1 : vector<8x64xf32>, vector<8x64xf32> -> vector<8x128xf32>
    %c3_i32 = arith.constant 3 : i32
    %c0_39 = arith.constant 0 : index
    %c0_40 = arith.constant 0 : index
    %176 = vector.load %arg5[%c0_39, %c0_40] : memref<128x512xf32, #tpu.memory_space<vmem>>, vector<128x512xf32>
    %cst_41 = arith.constant dense<0.000000e+00> : vector<8x512xf32>
    %177 = tpu.matmul %175, %176, %cst_41 {dimension_numbers = #tpu.dot_dimension_numbers<[1], [0], [0], [1], [0, 0, 1, 1], [], []>} : vector<8x128xf32>, vector<128x512xf32>, vector<8x512xf32> -> vector<8x512xf32>
    %178 = vector.extract_strided_slice %177 {offsets = [0, 256], sizes = [8, 256], strides = [1, 1]} : vector<8x512xf32> to vector<8x256xf32>
    %179 = arith.addf %178, %12 : vector<8x256xf32>
    %180 = vector.extract_strided_slice %179 {offsets = [0, 0], sizes = [8, 192], strides = [1, 1]} : vector<8x256xf32> to vector<8x192xf32>
    %181 = arith.negf %180 : vector<8x192xf32>
    %182 = math.exp %181 : vector<8x192xf32>
    %cst_42 = arith.constant 1.000000e+00 : f32
    %183 = vector.broadcast %cst_42 : f32 to vector<8x192xf32>
    %184 = arith.addf %183, %182 : vector<8x192xf32>
    %185 = arith.divf %183, %184 : vector<8x192xf32>
    %186 = vector.extract_strided_slice %185 {offsets = [0, 0], sizes = [8, 64], strides = [1, 1]} : vector<8x192xf32> to vector<8x64xf32>
    %187 = vector.extract_strided_slice %185 {offsets = [0, 64], sizes = [8, 64], strides = [1, 1]} : vector<8x192xf32> to vector<8x64xf32>
    %188 = vector.extract_strided_slice %185 {offsets = [0, 128], sizes = [8, 64], strides = [1, 1]} : vector<8x192xf32> to vector<8x64xf32>
    %189 = vector.extract_strided_slice %179 {offsets = [0, 192], sizes = [8, 64], strides = [1, 1]} : vector<8x256xf32> to vector<8x64xf32>
    %190 = math.tanh %189 : vector<8x64xf32>
    %191 = arith.mulf %187, %144 : vector<8x64xf32>
    %192 = arith.mulf %186, %190 : vector<8x64xf32>
    %193 = arith.addf %191, %192 : vector<8x64xf32>
    %194 = math.tanh %193 : vector<8x64xf32>
    %195 = arith.mulf %188, %194 : vector<8x64xf32>
    %196 = vector.broadcast %c3_i32 : i32 to vector<8x1xi32>
    %197 = arith.cmpi eq, %9, %196 : vector<8x1xi32>
    %198 = vector.shape_cast %197 : vector<8x1xi1> to vector<8x1xi1>
    %199 = vector.broadcast %198 : vector<8x1xi1> to vector<8x64xi1>
    %200 = arith.select %199, %195, %151 : vector<8x64xi1>, vector<8x64xf32>
    %c1_i32_43 = arith.constant 1 : i32
    %201 = arith.addi %c3_i32, %c1_i32_43 : i32
    %c8_i32_44 = arith.constant 8 : i32
    %202 = arith.muli %201, %c8_i32_44 : i32
    %203 = tpu.assume_multiple %202, 8 : i32
    %204 = arith.index_cast %203 : i32 to index
    %c0_45 = arith.constant 0 : index
    %205 = vector.load %arg14[%204, %c0_45] : memref<72x256xf32, #tpu.memory_space<vmem>>, vector<8x256xf32>
    %206 = vector.extract_strided_slice %177 {offsets = [0, 0], sizes = [8, 256], strides = [1, 1]} : vector<8x512xf32> to vector<8x256xf32>
    %207 = arith.addf %205, %206 : vector<8x256xf32>
    %208 = vector.extract_strided_slice %207 {offsets = [0, 0], sizes = [8, 192], strides = [1, 1]} : vector<8x256xf32> to vector<8x192xf32>
    %209 = arith.negf %208 : vector<8x192xf32>
    %210 = math.exp %209 : vector<8x192xf32>
    %cst_46 = arith.constant 1.000000e+00 : f32
    %211 = vector.broadcast %cst_46 : f32 to vector<8x192xf32>
    %212 = arith.addf %211, %210 : vector<8x192xf32>
    %213 = arith.divf %211, %212 : vector<8x192xf32>
    %214 = vector.extract_strided_slice %213 {offsets = [0, 0], sizes = [8, 64], strides = [1, 1]} : vector<8x192xf32> to vector<8x64xf32>
    %215 = vector.extract_strided_slice %213 {offsets = [0, 64], sizes = [8, 64], strides = [1, 1]} : vector<8x192xf32> to vector<8x64xf32>
    %216 = vector.extract_strided_slice %213 {offsets = [0, 128], sizes = [8, 64], strides = [1, 1]} : vector<8x192xf32> to vector<8x64xf32>
    %217 = vector.extract_strided_slice %207 {offsets = [0, 192], sizes = [8, 64], strides = [1, 1]} : vector<8x256xf32> to vector<8x64xf32>
    %218 = math.tanh %217 : vector<8x64xf32>
    %219 = arith.mulf %215, %172 : vector<8x64xf32>
    %220 = arith.mulf %214, %218 : vector<8x64xf32>
    %221 = arith.addf %219, %220 : vector<8x64xf32>
    %222 = math.tanh %221 : vector<8x64xf32>
    %223 = arith.mulf %216, %222 : vector<8x64xf32>
    %224 = tpu.concatenate %223, %195 in 1 : vector<8x64xf32>, vector<8x64xf32> -> vector<8x128xf32>
    %c4_i32 = arith.constant 4 : i32
    %c0_47 = arith.constant 0 : index
    %c0_48 = arith.constant 0 : index
    %225 = vector.load %arg5[%c0_47, %c0_48] : memref<128x512xf32, #tpu.memory_space<vmem>>, vector<128x512xf32>
    %cst_49 = arith.constant dense<0.000000e+00> : vector<8x512xf32>
    %226 = tpu.matmul %224, %225, %cst_49 {dimension_numbers = #tpu.dot_dimension_numbers<[1], [0], [0], [1], [0, 0, 1, 1], [], []>} : vector<8x128xf32>, vector<128x512xf32>, vector<8x512xf32> -> vector<8x512xf32>
    %227 = vector.extract_strided_slice %226 {offsets = [0, 256], sizes = [8, 256], strides = [1, 1]} : vector<8x512xf32> to vector<8x256xf32>
    %228 = arith.addf %227, %12 : vector<8x256xf32>
    %229 = vector.extract_strided_slice %228 {offsets = [0, 0], sizes = [8, 192], strides = [1, 1]} : vector<8x256xf32> to vector<8x192xf32>
    %230 = arith.negf %229 : vector<8x192xf32>
    %231 = math.exp %230 : vector<8x192xf32>
    %cst_50 = arith.constant 1.000000e+00 : f32
    %232 = vector.broadcast %cst_50 : f32 to vector<8x192xf32>
    %233 = arith.addf %232, %231 : vector<8x192xf32>
    %234 = arith.divf %232, %233 : vector<8x192xf32>
    %235 = vector.extract_strided_slice %234 {offsets = [0, 0], sizes = [8, 64], strides = [1, 1]} : vector<8x192xf32> to vector<8x64xf32>
    %236 = vector.extract_strided_slice %234 {offsets = [0, 64], sizes = [8, 64], strides = [1, 1]} : vector<8x192xf32> to vector<8x64xf32>
    %237 = vector.extract_strided_slice %234 {offsets = [0, 128], sizes = [8, 64], strides = [1, 1]} : vector<8x192xf32> to vector<8x64xf32>
    %238 = vector.extract_strided_slice %228 {offsets = [0, 192], sizes = [8, 64], strides = [1, 1]} : vector<8x256xf32> to vector<8x64xf32>
    %239 = math.tanh %238 : vector<8x64xf32>
    %240 = arith.mulf %236, %193 : vector<8x64xf32>
    %241 = arith.mulf %235, %239 : vector<8x64xf32>
    %242 = arith.addf %240, %241 : vector<8x64xf32>
    %243 = math.tanh %242 : vector<8x64xf32>
    %244 = arith.mulf %237, %243 : vector<8x64xf32>
    %245 = vector.broadcast %c4_i32 : i32 to vector<8x1xi32>
    %246 = arith.cmpi eq, %9, %245 : vector<8x1xi32>
    %247 = vector.shape_cast %246 : vector<8x1xi1> to vector<8x1xi1>
    %248 = vector.broadcast %247 : vector<8x1xi1> to vector<8x64xi1>
    %249 = arith.select %248, %244, %200 : vector<8x64xi1>, vector<8x64xf32>
    %c1_i32_51 = arith.constant 1 : i32
    %250 = arith.addi %c4_i32, %c1_i32_51 : i32
    %c8_i32_52 = arith.constant 8 : i32
    %251 = arith.muli %250, %c8_i32_52 : i32
    %252 = tpu.assume_multiple %251, 8 : i32
    %253 = arith.index_cast %252 : i32 to index
    %c0_53 = arith.constant 0 : index
    %254 = vector.load %arg14[%253, %c0_53] : memref<72x256xf32, #tpu.memory_space<vmem>>, vector<8x256xf32>
    %255 = vector.extract_strided_slice %226 {offsets = [0, 0], sizes = [8, 256], strides = [1, 1]} : vector<8x512xf32> to vector<8x256xf32>
    %256 = arith.addf %254, %255 : vector<8x256xf32>
    %257 = vector.extract_strided_slice %256 {offsets = [0, 0], sizes = [8, 192], strides = [1, 1]} : vector<8x256xf32> to vector<8x192xf32>
    %258 = arith.negf %257 : vector<8x192xf32>
    %259 = math.exp %258 : vector<8x192xf32>
    %cst_54 = arith.constant 1.000000e+00 : f32
    %260 = vector.broadcast %cst_54 : f32 to vector<8x192xf32>
    %261 = arith.addf %260, %259 : vector<8x192xf32>
    %262 = arith.divf %260, %261 : vector<8x192xf32>
    %263 = vector.extract_strided_slice %262 {offsets = [0, 0], sizes = [8, 64], strides = [1, 1]} : vector<8x192xf32> to vector<8x64xf32>
    %264 = vector.extract_strided_slice %262 {offsets = [0, 64], sizes = [8, 64], strides = [1, 1]} : vector<8x192xf32> to vector<8x64xf32>
    %265 = vector.extract_strided_slice %262 {offsets = [0, 128], sizes = [8, 64], strides = [1, 1]} : vector<8x192xf32> to vector<8x64xf32>
    %266 = vector.extract_strided_slice %256 {offsets = [0, 192], sizes = [8, 64], strides = [1, 1]} : vector<8x256xf32> to vector<8x64xf32>
    %267 = math.tanh %266 : vector<8x64xf32>
    %268 = arith.mulf %264, %221 : vector<8x64xf32>
    %269 = arith.mulf %263, %267 : vector<8x64xf32>
    %270 = arith.addf %268, %269 : vector<8x64xf32>
    %271 = math.tanh %270 : vector<8x64xf32>
    %272 = arith.mulf %265, %271 : vector<8x64xf32>
    %273 = tpu.concatenate %272, %244 in 1 : vector<8x64xf32>, vector<8x64xf32> -> vector<8x128xf32>
    %c5_i32 = arith.constant 5 : i32
    %c0_55 = arith.constant 0 : index
    %c0_56 = arith.constant 0 : index
    %274 = vector.load %arg5[%c0_55, %c0_56] : memref<128x512xf32, #tpu.memory_space<vmem>>, vector<128x512xf32>
    %cst_57 = arith.constant dense<0.000000e+00> : vector<8x512xf32>
    %275 = tpu.matmul %273, %274, %cst_57 {dimension_numbers = #tpu.dot_dimension_numbers<[1], [0], [0], [1], [0, 0, 1, 1], [], []>} : vector<8x128xf32>, vector<128x512xf32>, vector<8x512xf32> -> vector<8x512xf32>
    %276 = vector.extract_strided_slice %275 {offsets = [0, 256], sizes = [8, 256], strides = [1, 1]} : vector<8x512xf32> to vector<8x256xf32>
    %277 = arith.addf %276, %12 : vector<8x256xf32>
    %278 = vector.extract_strided_slice %277 {offsets = [0, 0], sizes = [8, 192], strides = [1, 1]} : vector<8x256xf32> to vector<8x192xf32>
    %279 = arith.negf %278 : vector<8x192xf32>
    %280 = math.exp %279 : vector<8x192xf32>
    %cst_58 = arith.constant 1.000000e+00 : f32
    %281 = vector.broadcast %cst_58 : f32 to vector<8x192xf32>
    %282 = arith.addf %281, %280 : vector<8x192xf32>
    %283 = arith.divf %281, %282 : vector<8x192xf32>
    %284 = vector.extract_strided_slice %283 {offsets = [0, 0], sizes = [8, 64], strides = [1, 1]} : vector<8x192xf32> to vector<8x64xf32>
    %285 = vector.extract_strided_slice %283 {offsets = [0, 64], sizes = [8, 64], strides = [1, 1]} : vector<8x192xf32> to vector<8x64xf32>
    %286 = vector.extract_strided_slice %283 {offsets = [0, 128], sizes = [8, 64], strides = [1, 1]} : vector<8x192xf32> to vector<8x64xf32>
    %287 = vector.extract_strided_slice %277 {offsets = [0, 192], sizes = [8, 64], strides = [1, 1]} : vector<8x256xf32> to vector<8x64xf32>
    %288 = math.tanh %287 : vector<8x64xf32>
    %289 = arith.mulf %285, %242 : vector<8x64xf32>
    %290 = arith.mulf %284, %288 : vector<8x64xf32>
    %291 = arith.addf %289, %290 : vector<8x64xf32>
    %292 = math.tanh %291 : vector<8x64xf32>
    %293 = arith.mulf %286, %292 : vector<8x64xf32>
    %294 = vector.broadcast %c5_i32 : i32 to vector<8x1xi32>
    %295 = arith.cmpi eq, %9, %294 : vector<8x1xi32>
    %296 = vector.shape_cast %295 : vector<8x1xi1> to vector<8x1xi1>
    %297 = vector.broadcast %296 : vector<8x1xi1> to vector<8x64xi1>
    %298 = arith.select %297, %293, %249 : vector<8x64xi1>, vector<8x64xf32>
    %c1_i32_59 = arith.constant 1 : i32
    %299 = arith.addi %c5_i32, %c1_i32_59 : i32
    %c8_i32_60 = arith.constant 8 : i32
    %300 = arith.muli %299, %c8_i32_60 : i32
    %301 = tpu.assume_multiple %300, 8 : i32
    %302 = arith.index_cast %301 : i32 to index
    %c0_61 = arith.constant 0 : index
    %303 = vector.load %arg14[%302, %c0_61] : memref<72x256xf32, #tpu.memory_space<vmem>>, vector<8x256xf32>
    %304 = vector.extract_strided_slice %275 {offsets = [0, 0], sizes = [8, 256], strides = [1, 1]} : vector<8x512xf32> to vector<8x256xf32>
    %305 = arith.addf %303, %304 : vector<8x256xf32>
    %306 = vector.extract_strided_slice %305 {offsets = [0, 0], sizes = [8, 192], strides = [1, 1]} : vector<8x256xf32> to vector<8x192xf32>
    %307 = arith.negf %306 : vector<8x192xf32>
    %308 = math.exp %307 : vector<8x192xf32>
    %cst_62 = arith.constant 1.000000e+00 : f32
    %309 = vector.broadcast %cst_62 : f32 to vector<8x192xf32>
    %310 = arith.addf %309, %308 : vector<8x192xf32>
    %311 = arith.divf %309, %310 : vector<8x192xf32>
    %312 = vector.extract_strided_slice %311 {offsets = [0, 0], sizes = [8, 64], strides = [1, 1]} : vector<8x192xf32> to vector<8x64xf32>
    %313 = vector.extract_strided_slice %311 {offsets = [0, 64], sizes = [8, 64], strides = [1, 1]} : vector<8x192xf32> to vector<8x64xf32>
    %314 = vector.extract_strided_slice %311 {offsets = [0, 128], sizes = [8, 64], strides = [1, 1]} : vector<8x192xf32> to vector<8x64xf32>
    %315 = vector.extract_strided_slice %305 {offsets = [0, 192], sizes = [8, 64], strides = [1, 1]} : vector<8x256xf32> to vector<8x64xf32>
    %316 = math.tanh %315 : vector<8x64xf32>
    %317 = arith.mulf %313, %270 : vector<8x64xf32>
    %318 = arith.mulf %312, %316 : vector<8x64xf32>
    %319 = arith.addf %317, %318 : vector<8x64xf32>
    %320 = math.tanh %319 : vector<8x64xf32>
    %321 = arith.mulf %314, %320 : vector<8x64xf32>
    %322 = tpu.concatenate %321, %293 in 1 : vector<8x64xf32>, vector<8x64xf32> -> vector<8x128xf32>
    %c6_i32 = arith.constant 6 : i32
    %c0_63 = arith.constant 0 : index
    %c0_64 = arith.constant 0 : index
    %323 = vector.load %arg5[%c0_63, %c0_64] : memref<128x512xf32, #tpu.memory_space<vmem>>, vector<128x512xf32>
    %cst_65 = arith.constant dense<0.000000e+00> : vector<8x512xf32>
    %324 = tpu.matmul %322, %323, %cst_65 {dimension_numbers = #tpu.dot_dimension_numbers<[1], [0], [0], [1], [0, 0, 1, 1], [], []>} : vector<8x128xf32>, vector<128x512xf32>, vector<8x512xf32> -> vector<8x512xf32>
    %325 = vector.extract_strided_slice %324 {offsets = [0, 256], sizes = [8, 256], strides = [1, 1]} : vector<8x512xf32> to vector<8x256xf32>
    %326 = arith.addf %325, %12 : vector<8x256xf32>
    %327 = vector.extract_strided_slice %326 {offsets = [0, 0], sizes = [8, 192], strides = [1, 1]} : vector<8x256xf32> to vector<8x192xf32>
    %328 = arith.negf %327 : vector<8x192xf32>
    %329 = math.exp %328 : vector<8x192xf32>
    %cst_66 = arith.constant 1.000000e+00 : f32
    %330 = vector.broadcast %cst_66 : f32 to vector<8x192xf32>
    %331 = arith.addf %330, %329 : vector<8x192xf32>
    %332 = arith.divf %330, %331 : vector<8x192xf32>
    %333 = vector.extract_strided_slice %332 {offsets = [0, 0], sizes = [8, 64], strides = [1, 1]} : vector<8x192xf32> to vector<8x64xf32>
    %334 = vector.extract_strided_slice %332 {offsets = [0, 64], sizes = [8, 64], strides = [1, 1]} : vector<8x192xf32> to vector<8x64xf32>
    %335 = vector.extract_strided_slice %332 {offsets = [0, 128], sizes = [8, 64], strides = [1, 1]} : vector<8x192xf32> to vector<8x64xf32>
    %336 = vector.extract_strided_slice %326 {offsets = [0, 192], sizes = [8, 64], strides = [1, 1]} : vector<8x256xf32> to vector<8x64xf32>
    %337 = math.tanh %336 : vector<8x64xf32>
    %338 = arith.mulf %334, %291 : vector<8x64xf32>
    %339 = arith.mulf %333, %337 : vector<8x64xf32>
    %340 = arith.addf %338, %339 : vector<8x64xf32>
    %341 = math.tanh %340 : vector<8x64xf32>
    %342 = arith.mulf %335, %341 : vector<8x64xf32>
    %343 = vector.broadcast %c6_i32 : i32 to vector<8x1xi32>
    %344 = arith.cmpi eq, %9, %343 : vector<8x1xi32>
    %345 = vector.shape_cast %344 : vector<8x1xi1> to vector<8x1xi1>
    %346 = vector.broadcast %345 : vector<8x1xi1> to vector<8x64xi1>
    %347 = arith.select %346, %342, %298 : vector<8x64xi1>, vector<8x64xf32>
    %c1_i32_67 = arith.constant 1 : i32
    %348 = arith.addi %c6_i32, %c1_i32_67 : i32
    %c8_i32_68 = arith.constant 8 : i32
    %349 = arith.muli %348, %c8_i32_68 : i32
    %350 = tpu.assume_multiple %349, 8 : i32
    %351 = arith.index_cast %350 : i32 to index
    %c0_69 = arith.constant 0 : index
    %352 = vector.load %arg14[%351, %c0_69] : memref<72x256xf32, #tpu.memory_space<vmem>>, vector<8x256xf32>
    %353 = vector.extract_strided_slice %324 {offsets = [0, 0], sizes = [8, 256], strides = [1, 1]} : vector<8x512xf32> to vector<8x256xf32>
    %354 = arith.addf %352, %353 : vector<8x256xf32>
    %355 = vector.extract_strided_slice %354 {offsets = [0, 0], sizes = [8, 192], strides = [1, 1]} : vector<8x256xf32> to vector<8x192xf32>
    %356 = arith.negf %355 : vector<8x192xf32>
    %357 = math.exp %356 : vector<8x192xf32>
    %cst_70 = arith.constant 1.000000e+00 : f32
    %358 = vector.broadcast %cst_70 : f32 to vector<8x192xf32>
    %359 = arith.addf %358, %357 : vector<8x192xf32>
    %360 = arith.divf %358, %359 : vector<8x192xf32>
    %361 = vector.extract_strided_slice %360 {offsets = [0, 0], sizes = [8, 64], strides = [1, 1]} : vector<8x192xf32> to vector<8x64xf32>
    %362 = vector.extract_strided_slice %360 {offsets = [0, 64], sizes = [8, 64], strides = [1, 1]} : vector<8x192xf32> to vector<8x64xf32>
    %363 = vector.extract_strided_slice %360 {offsets = [0, 128], sizes = [8, 64], strides = [1, 1]} : vector<8x192xf32> to vector<8x64xf32>
    %364 = vector.extract_strided_slice %354 {offsets = [0, 192], sizes = [8, 64], strides = [1, 1]} : vector<8x256xf32> to vector<8x64xf32>
    %365 = math.tanh %364 : vector<8x64xf32>
    %366 = arith.mulf %362, %319 : vector<8x64xf32>
    %367 = arith.mulf %361, %365 : vector<8x64xf32>
    %368 = arith.addf %366, %367 : vector<8x64xf32>
    %369 = math.tanh %368 : vector<8x64xf32>
    %370 = arith.mulf %363, %369 : vector<8x64xf32>
    %371 = tpu.concatenate %370, %342 in 1 : vector<8x64xf32>, vector<8x64xf32> -> vector<8x128xf32>
    %c7_i32 = arith.constant 7 : i32
    %c0_71 = arith.constant 0 : index
    %c0_72 = arith.constant 0 : index
    %372 = vector.load %arg5[%c0_71, %c0_72] : memref<128x512xf32, #tpu.memory_space<vmem>>, vector<128x512xf32>
    %cst_73 = arith.constant dense<0.000000e+00> : vector<8x512xf32>
    %373 = tpu.matmul %371, %372, %cst_73 {dimension_numbers = #tpu.dot_dimension_numbers<[1], [0], [0], [1], [0, 0, 1, 1], [], []>} : vector<8x128xf32>, vector<128x512xf32>, vector<8x512xf32> -> vector<8x512xf32>
    %374 = vector.extract_strided_slice %373 {offsets = [0, 256], sizes = [8, 256], strides = [1, 1]} : vector<8x512xf32> to vector<8x256xf32>
    %375 = arith.addf %374, %12 : vector<8x256xf32>
    %376 = vector.extract_strided_slice %375 {offsets = [0, 0], sizes = [8, 192], strides = [1, 1]} : vector<8x256xf32> to vector<8x192xf32>
    %377 = arith.negf %376 : vector<8x192xf32>
    %378 = math.exp %377 : vector<8x192xf32>
    %cst_74 = arith.constant 1.000000e+00 : f32
    %379 = vector.broadcast %cst_74 : f32 to vector<8x192xf32>
    %380 = arith.addf %379, %378 : vector<8x192xf32>
    %381 = arith.divf %379, %380 : vector<8x192xf32>
    %382 = vector.extract_strided_slice %381 {offsets = [0, 0], sizes = [8, 64], strides = [1, 1]} : vector<8x192xf32> to vector<8x64xf32>
    %383 = vector.extract_strided_slice %381 {offsets = [0, 64], sizes = [8, 64], strides = [1, 1]} : vector<8x192xf32> to vector<8x64xf32>
    %384 = vector.extract_strided_slice %381 {offsets = [0, 128], sizes = [8, 64], strides = [1, 1]} : vector<8x192xf32> to vector<8x64xf32>
    %385 = vector.extract_strided_slice %375 {offsets = [0, 192], sizes = [8, 64], strides = [1, 1]} : vector<8x256xf32> to vector<8x64xf32>
    %386 = math.tanh %385 : vector<8x64xf32>
    %387 = arith.mulf %383, %340 : vector<8x64xf32>
    %388 = arith.mulf %382, %386 : vector<8x64xf32>
    %389 = arith.addf %387, %388 : vector<8x64xf32>
    %390 = math.tanh %389 : vector<8x64xf32>
    %391 = arith.mulf %384, %390 : vector<8x64xf32>
    %392 = vector.broadcast %c7_i32 : i32 to vector<8x1xi32>
    %393 = arith.cmpi eq, %9, %392 : vector<8x1xi32>
    %394 = vector.shape_cast %393 : vector<8x1xi1> to vector<8x1xi1>
    %395 = vector.broadcast %394 : vector<8x1xi1> to vector<8x64xi1>
    %396 = arith.select %395, %391, %347 : vector<8x64xi1>, vector<8x64xf32>
    %c1_i32_75 = arith.constant 1 : i32
    %397 = arith.addi %c7_i32, %c1_i32_75 : i32
    %c8_i32_76 = arith.constant 8 : i32
    %398 = arith.muli %397, %c8_i32_76 : i32
    %399 = tpu.assume_multiple %398, 8 : i32
    %400 = arith.index_cast %399 : i32 to index
    %c0_77 = arith.constant 0 : index
    %401 = vector.load %arg14[%400, %c0_77] : memref<72x256xf32, #tpu.memory_space<vmem>>, vector<8x256xf32>
    %402 = vector.extract_strided_slice %373 {offsets = [0, 0], sizes = [8, 256], strides = [1, 1]} : vector<8x512xf32> to vector<8x256xf32>
    %403 = arith.addf %401, %402 : vector<8x256xf32>
    %404 = vector.extract_strided_slice %403 {offsets = [0, 0], sizes = [8, 192], strides = [1, 1]} : vector<8x256xf32> to vector<8x192xf32>
    %405 = arith.negf %404 : vector<8x192xf32>
    %406 = math.exp %405 : vector<8x192xf32>
    %cst_78 = arith.constant 1.000000e+00 : f32
    %407 = vector.broadcast %cst_78 : f32 to vector<8x192xf32>
    %408 = arith.addf %407, %406 : vector<8x192xf32>
    %409 = arith.divf %407, %408 : vector<8x192xf32>
    %410 = vector.extract_strided_slice %409 {offsets = [0, 0], sizes = [8, 64], strides = [1, 1]} : vector<8x192xf32> to vector<8x64xf32>
    %411 = vector.extract_strided_slice %409 {offsets = [0, 64], sizes = [8, 64], strides = [1, 1]} : vector<8x192xf32> to vector<8x64xf32>
    %412 = vector.extract_strided_slice %409 {offsets = [0, 128], sizes = [8, 64], strides = [1, 1]} : vector<8x192xf32> to vector<8x64xf32>
    %413 = vector.extract_strided_slice %403 {offsets = [0, 192], sizes = [8, 64], strides = [1, 1]} : vector<8x256xf32> to vector<8x64xf32>
    %414 = math.tanh %413 : vector<8x64xf32>
    %415 = arith.mulf %411, %368 : vector<8x64xf32>
    %416 = arith.mulf %410, %414 : vector<8x64xf32>
    %417 = arith.addf %415, %416 : vector<8x64xf32>
    %418 = math.tanh %417 : vector<8x64xf32>
    %419 = arith.mulf %412, %418 : vector<8x64xf32>
    %420 = tpu.concatenate %419, %391 in 1 : vector<8x64xf32>, vector<8x64xf32> -> vector<8x128xf32>
    %c8_i32_79 = arith.constant 8 : i32
    %c0_80 = arith.constant 0 : index
    %c0_81 = arith.constant 0 : index
    %421 = vector.load %arg7[%c0_80, %c0_81] : memref<64x128xf32, #tpu.memory_space<vmem>>, vector<64x128xf32>
    %cst_82 = arith.constant dense<0.000000e+00> : vector<8x128xf32>
    %422 = tpu.matmul %396, %421, %cst_82 {dimension_numbers = #tpu.dot_dimension_numbers<[1], [0], [0], [1], [0, 0, 1, 1], [], []>} : vector<8x64xf32>, vector<64x128xf32>, vector<8x128xf32> -> vector<8x128xf32>
    %c0_83 = arith.constant 0 : index
    %c0_84 = arith.constant 0 : index
    %423 = vector.load %arg8[%c0_83, %c0_84] : memref<1x128xf32, #tpu.memory_space<vmem>>, vector<1x128xf32>
    %424 = vector.broadcast %423 : vector<1x128xf32> to vector<8x128xf32>
    %425 = arith.addf %422, %424 : vector<8x128xf32>
    %c0_85 = arith.constant 0 : index
    %c0_86 = arith.constant 0 : index
    %426 = vector.load %arg9[%c0_85, %c0_86] : memref<1x128xf32, #tpu.memory_space<vmem>>, vector<1x128xf32>
    %427 = vector.broadcast %426 : vector<1x128xf32> to vector<8x128xf32>
    %428 = arith.mulf %425, %427 : vector<8x128xf32>
    %c0_87 = arith.constant 0 : index
    %c0_88 = arith.constant 0 : index
    %429 = vector.load %arg10[%c0_87, %c0_88] : memref<1x128xf32, #tpu.memory_space<vmem>>, vector<1x128xf32>
    %430 = vector.broadcast %429 : vector<1x128xf32> to vector<8x128xf32>
    %431 = arith.addf %428, %430 : vector<8x128xf32>
    %cst_89 = arith.constant 0.000000e+00 : f32
    %432 = vector.broadcast %cst_89 : f32 to vector<8x128xf32>
    %433 = arith.maximumf %431, %432 : vector<8x128xf32>
    %c0_90 = arith.constant 0 : index
    %c0_91 = arith.constant 0 : index
    %434 = vector.load %arg11[%c0_90, %c0_91] : memref<128x128xf32, #tpu.memory_space<vmem>>, vector<128x128xf32>
    %cst_92 = arith.constant dense<0.000000e+00> : vector<8x128xf32>
    %435 = tpu.matmul %433, %434, %cst_92 {dimension_numbers = #tpu.dot_dimension_numbers<[1], [0], [0], [1], [0, 0, 1, 1], [], []>} : vector<8x128xf32>, vector<128x128xf32>, vector<8x128xf32> -> vector<8x128xf32>
    %c0_93 = arith.constant 0 : index
    %c0_94 = arith.constant 0 : index
    %436 = vector.load %arg12[%c0_93, %c0_94] : memref<1x128xf32, #tpu.memory_space<vmem>>, vector<1x128xf32>
    %437 = vector.broadcast %436 : vector<1x128xf32> to vector<8x128xf32>
    %438 = arith.addf %435, %437 : vector<8x128xf32>
    %c0_95 = arith.constant 0 : index
    %c0_96 = arith.constant 0 : index
    %439 = vector.load %arg13[%c0_95, %c0_96] : memref<8x128xf32, #tpu.memory_space<vmem>>, vector<8x128xf32>
    tpu.vector_store %arg13[%c0_95, %c0_96], %438 {strides = array<i32>} : memref<8x128xf32, #tpu.memory_space<vmem>>, vector<8x128xf32>,
    return
  }
  func.func @transform_0(%arg0: i32) -> (i32, i32) {
    %c0_i32 = arith.constant 0 : i32
    %c0_i32_0 = arith.constant 0 : i32
    return %arg0, %c0_i32 : i32, i32
  }
  func.func @transform_1(%arg0: i32) -> (i32, i32) {
    %c0_i32 = arith.constant 0 : i32
    %c0_i32_0 = arith.constant 0 : i32
    return %arg0, %c0_i32 : i32, i32
  }
  func.func @transform_2(%arg0: i32) -> (i32, i32) {
    %c0_i32 = arith.constant 0 : i32
    %c0_i32_0 = arith.constant 0 : i32
    %c0_i32_1 = arith.constant 0 : i32
    return %c0_i32, %c0_i32_0 : i32, i32
  }
  func.func @transform_3(%arg0: i32) -> (i32, i32) {
    %c0_i32 = arith.constant 0 : i32
    %c0_i32_0 = arith.constant 0 : i32
    %c0_i32_1 = arith.constant 0 : i32
    return %c0_i32, %c0_i32_0 : i32, i32
  }
  func.func @transform_4(%arg0: i32) -> (i32, i32) {
    %c0_i32 = arith.constant 0 : i32
    %c0_i32_0 = arith.constant 0 : i32
    %c0_i32_1 = arith.constant 0 : i32
    return %c0_i32, %c0_i32_0 : i32, i32
  }
  func.func @transform_5(%arg0: i32) -> (i32, i32) {
    %c0_i32 = arith.constant 0 : i32
    %c0_i32_0 = arith.constant 0 : i32
    %c0_i32_1 = arith.constant 0 : i32
    return %c0_i32, %c0_i32_0 : i32, i32
  }
  func.func @transform_6(%arg0: i32) -> (i32, i32) {
    %c0_i32 = arith.constant 0 : i32
    %c0_i32_0 = arith.constant 0 : i32
    %c0_i32_1 = arith.constant 0 : i32
    return %c0_i32, %c0_i32_0 : i32, i32
  }
  func.func @transform_7(%arg0: i32) -> (i32, i32) {
    %c0_i32 = arith.constant 0 : i32
    %c0_i32_0 = arith.constant 0 : i32
    %c0_i32_1 = arith.constant 0 : i32
    return %c0_i32, %c0_i32_0 : i32, i32
  }
  func.func @transform_8(%arg0: i32) -> (i32, i32) {
    %c0_i32 = arith.constant 0 : i32
    %c0_i32_0 = arith.constant 0 : i32
    %c0_i32_1 = arith.constant 0 : i32
    return %c0_i32, %c0_i32_0 : i32, i32
  }
  func.func @transform_9(%arg0: i32) -> (i32, i32) {
    %c0_i32 = arith.constant 0 : i32
    %c0_i32_0 = arith.constant 0 : i32
    %c0_i32_1 = arith.constant 0 : i32
    return %c0_i32, %c0_i32_0 : i32, i32
  }
  func.func @transform_10(%arg0: i32) -> (i32, i32) {
    %c0_i32 = arith.constant 0 : i32
    %c0_i32_0 = arith.constant 0 : i32
    %c0_i32_1 = arith.constant 0 : i32
    return %c0_i32, %c0_i32_0 : i32, i32
  }
  func.func @transform_11(%arg0: i32) -> (i32, i32) {
    %c0_i32 = arith.constant 0 : i32
    %c0_i32_0 = arith.constant 0 : i32
    %c0_i32_1 = arith.constant 0 : i32
    return %c0_i32, %c0_i32_0 : i32, i32
  }
  func.func @transform_12(%arg0: i32) -> (i32, i32) {
    %c0_i32 = arith.constant 0 : i32
    %c0_i32_0 = arith.constant 0 : i32
    return %arg0, %c0_i32 : i32, i32
  }
}

</mosaic_0001>

<bundles_post_ra>
// kernel: tpu_custom_call.1
= control target key start
LH: loop header
LB: loop body
LE: loop exit
PB: predicated region body
PF: predicated region fallthrough
CT: control target
= control target key end

     0   :  { %17 = vsyncpa [#allocation4], 0  ;;  %s4134_s0 = inlined_call_operand.vmem [shape: f32[72,16], index: 0, kind: input, shape index: {}]   ;;  %s4135_s1 = inlined_call_operand.vmem [shape: s32[8,1], index: 1, kind: input, shape index: {}]   ;;  %s4136_s2 = inlined_call_operand.hbm [shape: f32[16,256], index: 2, kind: input, shape index: {}]   ;;  %s4137_s3 = inlined_call_operand.vmem [shape: f32[1,256], index: 3, kind: input, shape index: {}]   ;;  %s4138_s4 = inlined_call_operand.hbm [shape: f32[128,512], index: 4, kind: input, shape index: {}]   ;;  %s4139_s5 = inlined_call_operand.vmem [shape: f32[1,256], index: 5, kind: input, shape index: {}]   ;;  %s4140_s6 = inlined_call_operand.hbm [shape: f32[64,128], index: 6, kind: input, shape index: {}]   ;;  %s4141_s7 = inlined_call_operand.vmem [shape: f32[1,128], index: 7, kind: input, shape index: {}]   ;;  %s4142_s8 = inlined_call_operand.vmem [shape: f32[1,128], index: 8, kind: input, shape index: {}]   ;;  %s4143_s9 = inlined_call_operand.hbm [shape: f32[1,128], index: 9, kind: input, shape index: {}]   ;;  %s4144_s10 = inlined_call_operand.vmem [shape: f32[128,128], index: 10, kind: input, shape index: {}]   ;;  %s4145_s11 = inlined_call_operand.vmem [shape: f32[1,128], index: 11, kind: input, shape index: {}]   ;;  %s4146_s12 = inlined_call_operand.hbm [shape: f32[8,128], index: 12, kind: output, shape index: {}]  }
   0x1   :  { %18 = vsyncpa [#allocation7], 0 }
   0x2   :  { %19 = vsyncpa [#allocation10], 0 }
   0x3   :  { %20 = vsyncpa [#allocation5], 0  ;;  %s3290_s21 = smov [#allocation6]   ;;  %s3172_s25 = scalar_lea.hbm %s4138_s4, 8192 }
   0x4   :  { %s44_s22 = sshll.u32 %s3290_s21, 4  ;;  %p3173_p0 = scmp.ne.s32.totalorder %s4138_s4, %s3172_s25  ;;  %s45_s22 = int_to_ptr.vmem [resolvable:$true] %s44_s22 }
   0x5   :  { %p3176_p1 = scmp.lt.u32.totalorder %s3172_s25, %s4138_s4 }
   0x7   :  { %p3178_p2 = pnand %p3176_p1, %p3173_p0 }
   0x9   :  { %3181 = shalt.err (!%p3178_p2)
}
   0xa   :  { %s3182_s30 = scalar_lea.vmem %s45_s22, 8192  ;;  %p3187_p4 = scmp.lt.s32.totalorder %s45_s22, %s45_s22 }
   0xb   :  { %p3183_p3 = scmp.ne.s32.totalorder %s45_s22, %s3182_s30  ;;  %p3188_p5 = scmp.lt.s32.totalorder %s3182_s30, %s3182_s30 }
   0xd   :  { %p3189_p6 = por %p3188_p5, %p3187_p4 }
   0xf   :  { %p3190_p7 = pnand %p3189_p6, %p3183_p3 }
  0x11   :  { %3193 = shalt.err (!%p3190_p7)
}
  0x12   :  { %s3291_s13 = smov 512   ;;  %s3292_s14 = smov 32  }
  0x13   :  { %50 = dma.hbm_to_vmem [thread:$0]  %s4138_s4, 8192, %s45_s22, [#allocation7], %s3291_s13, %s3291_s13, %s3292_s14  }
  0x14   :  { %s3293_s17 = smov [#allocation3]   ;;  %s3194_s21 = scalar_lea.hbm %s4136_s2, 512 }
  0x15   :  { %s30_s18 = sshll.u32 %s3293_s17, 4  ;;  %p3195_p8 = scmp.ne.s32.totalorder %s4136_s2, %s3194_s21  ;;  %s31_s18 = int_to_ptr.vmem [resolvable:$true] %s30_s18 }
  0x16   :  { %p3198_p9 = scmp.lt.u32.totalorder %s3194_s21, %s4136_s2 }
  0x18   :  { %p3200_p10 = pnand %p3198_p9, %p3195_p8 }
  0x1a   :  { %3203 = shalt.err (!%p3200_p10)
}
  0x1b   :  { %s3204_s27 = scalar_lea.vmem %s31_s18, 512  ;;  %p3209_p12 = scmp.lt.s32.totalorder %s31_s18, %s31_s18 }
  0x1c   :  { %p3205_p11 = scmp.ne.s32.totalorder %s31_s18, %s3204_s27  ;;  %p3210_p13 = scmp.lt.s32.totalorder %s3204_s27, %s3204_s27 }
  0x1e   :  { %p3211_p0 = por %p3210_p13, %p3209_p12 }
  0x20   :  { %p3212_p1 = pnand %p3211_p0, %p3205_p11 }
  0x22   :  { %3215 = shalt.err (!%p3212_p1)
}
  0x23   :  { %s3294_s4 = smov 256   ;;  %s3295_s22 = smov 16  }
  0x24   :  { %36 = dma.hbm_to_vmem [thread:$0]  %s4136_s2, 512, %s31_s18, [#allocation4], %s3294_s4, %s3294_s4, %s3295_s22  }
  0x25   :  { %s3296_s30 = smov [#allocation8]   ;;  %s3216_s16 = scalar_lea.hbm %s4140_s6, 1024 }
  0x26   :  { %s58_s13 = sshll.u32 %s3296_s30, 4  ;;  %p3217_p2 = scmp.ne.s32.totalorder %s4140_s6, %s3216_s16  ;;  %s59_s13 = int_to_ptr.vmem [resolvable:$true] %s58_s13 }
  0x27   :  { %p3220_p3 = scmp.lt.u32.totalorder %s3216_s16, %s4140_s6 }
  0x29   :  { %p3222_p4 = pnand %p3220_p3, %p3217_p2 }
  0x2b   :  { %3225 = shalt.err (!%p3222_p4)
}
  0x2c   :  { %s3226_s23 = scalar_lea.vmem %s59_s13, 1024  ;;  %p3231_p6 = scmp.lt.s32.totalorder %s59_s13, %s59_s13 }
  0x2d   :  { %p3227_p5 = scmp.ne.s32.totalorder %s59_s13, %s3226_s23  ;;  %p3232_p7 = scmp.lt.s32.totalorder %s3226_s23, %s3226_s23 }
  0x2f   :  { %p3233_p8 = por %p3232_p7, %p3231_p6 }
  0x31   :  { %p3234_p9 = pnand %p3233_p8, %p3227_p5 }
  0x33   :  { %3237 = shalt.err (!%p3234_p9)
}
  0x34   :  { %s3297_s2 = smov 128   ;;  %s3298_s18 = smov 8  }
  0x35   :  { %64 = dma.hbm_to_vmem [thread:$0]  %s4140_s6, 1024, %s59_s13, [#allocation7], %s3297_s2, %s3297_s2, %s3298_s18  }
  0x36   :  { %s3299_s26 = smov [#allocation9]   ;;  %s3238_s28 = scalar_lea.hbm %s4143_s9, 16 }
  0x37   :  { %s75_s27 = sshll.u32 %s3299_s26, 4  ;;  %p3239_p10 = scmp.ne.s32.totalorder %s4143_s9, %s3238_s28  ;;  %s76_s27 = int_to_ptr.vmem [resolvable:$true] %s75_s27 }
  0x38   :  { %p3242_p11 = scmp.lt.u32.totalorder %s3238_s28, %s4143_s9 }
  0x3a   :  { %p3244_p12 = pnand %p3242_p11, %p3239_p10 }
  0x3c   :  { %3247 = shalt.err (!%p3244_p12)
}
  0x3d   :  { %s3248_s16 = scalar_lea.vmem %s76_s27, 16  ;;  %s3252_s6 = scalar_lea.vmem %s76_s27, 32 }
  0x3e   :  { %p3249_p13 = scmp.ne.s32.totalorder %s76_s27, %s3248_s16  ;;  %p3253_p0 = scmp.lt.s32.totalorder %s76_s27, %s76_s27 }
  0x3f   :  { %p3254_p1 = scmp.lt.s32.totalorder %s3252_s6, %s3248_s16 }
  0x41   :  { %p3255_p2 = por %p3254_p1, %p3253_p0 }
  0x43   :  { %p3256_p3 = pnand %p3255_p2, %p3249_p13 }
  0x45   :  { %3259 = shalt.err (!%p3256_p3)
}
  0x46   :  { %78 = dma.hbm_to_vmem [thread:$0]  %s4143_s9, 16, %s76_s27, [#allocation10]  }
  0x47   :  { %3282 = dma.done.wait [#allocation4], 512  }
  0x48   :  { %3283 = vsyncadd [#allocation4], 4294966784 }
  0x49   :  { %3284 = dma.done.wait [#allocation7], 9216  }
  0x4a   :  { %3285 = vsyncadd [#allocation7], 4294958080 }
  0x4b   :  { %3286 = dma.done.wait [#allocation10], 16  }
  0x4c   :  { %3287 = vsyncadd [#allocation10], 4294967280  ;;  %v4147_v0 = vmov 0.0   ;;  %v105_v1 = vld [vmem:[#allocation3 + $0x8] sm:$0xff]  ;;  %v107_v2 = vld [vmem:[#allocation3 + $0x18] sm:$0xff]  ;;  %vm120_vm0 = vcmask 130048  }
  0x4d   :  { %212 = vmatprep.mubr.f32.mxu1 %v4147_v0  ;;  %451 = vmatprep.mubr.f32.mxu0 %v4147_v0  ;;  %v104_v3 = vld [vmem:[#allocation3] sm:$0xff]  ;;  %v2414_v4 = vpack.c.bf16 %v107_v2, %v105_v1  ;;  %v106_v5 = vld [vmem:[#allocation3 + $0x10] sm:$0xff]  ;;  %v326_v8 = vld [vmem:[#allocation6 + $0x18] sm:$0xff]  ;;  %vm321_vm1 = vcmask 523264   ;;  %vm3304_vm10 = vmmov 0   ;;  %s3305_s27 = smov [#allocation11]  }
  0x4e   :  { %v2416_v6 = vpack.c.bf16 %v106_v5, %v104_v3  ;;  %v95_v7 = vld [vmem:[%s4134_s0] sm:$0xff]  ;;  %v330_v9 = vld [vmem:[#allocation6 + $0x38] sm:$0xff]  ;;  %v325_v10 = vld [vmem:[#allocation6 + $0x10] sm:$0xff]  ;;  %s2267_s4 = sshll.u32 %s3305_s27, 4  ;;  %s2268_s4 = int_to_ptr.vmem [resolvable:$true] %s2267_s4 }
  0x4f   :  { %2415 = vmatprep.subr.bf16.mxu1 %v2414_v4  ;;  %v3426_v11 = vpack.c.bf16 %v330_v9, %v326_v8  ;;  %v329_v12 = vld [vmem:[#allocation6 + $0x30] sm:$0xff]  ;;  %v96_v13 = vld [vmem:[%s4134_s0 + $0x8] sm:$0xff]  ;;  %v334_v17 = vld [vmem:[#allocation6 + $0x58] sm:$0xff]  ;;  %p3265_p5 = scmp.lt.s32.totalorder %s2268_s4, %s2268_s4 }
  0x50   :  { %2417 = vmatpush1.bf16.msra.mxu1 %v2416_v6  ;;  %v324_v14 = vld [vmem:[#allocation6 + $0x8] sm:$0xff]  ;;  %v3431_v15 = vpack.c.bf16 %v329_v12, %v325_v10  ;;  %v338_v18 = vld [vmem:[#allocation6 + $0x78] sm:$0xff]  ;;  %v323_v21 = vld [vmem:[#allocation6] sm:$0xff] }
  0x51   :  { %v328_v16 = vld [vmem:[#allocation6 + $0x28] sm:$0xff]  ;;  %2451 = vmatprep.subr.bf16.mxu1 %v3426_v11  ;;  %v3437_v20 = vpack.c.bf16 %v338_v18, %v334_v17  ;;  %v327_v22 = vld [vmem:[#allocation6 + $0x20] sm:$0xff]  ;;  %v333_v23 = vld [vmem:[#allocation6 + $0x50] sm:$0xff] }
  0x52   :  { %v3435_v19 = vpack.c.bf16 %v328_v16, %v324_v14  ;;  %v3441_v24 = vpack.c.bf16 %v327_v22, %v323_v21  ;;  %v337_v25 = vld [vmem:[#allocation6 + $0x70] sm:$0xff]  ;;  %v332_v27 = vld [vmem:[#allocation6 + $0x48] sm:$0xff]  ;;  %v342_v30 = vld [vmem:[#allocation6 + $0x98] sm:$0xff] }
  0x53   :  { %2285 = vmatmul.mubr.msk.f32.vlgmr.msra.gmra.mrb[0].mxu1 %vm120_vm0, %v95_v7  ;;  %v97_v26 = vld [vmem:[%s4134_s0 + $0x10] sm:$0xff]  ;;  %v3448_v28 = vpack.c.bf16 %v337_v25, %v333_v23  ;;  %v336_v29 = vld [vmem:[#allocation6 + $0x68] sm:$0xff]  ;;  %v346_v31 = vld [vmem:[#allocation6 + $0xb8] sm:$0xff]  ;;  %v110_v7 = vlaneseq }
  0x54   :  { %218 = vmatprep.mubr.f32.mxu1 %v4147_v0  ;;  %2453 = vmatpush1.bf16.msra.mxu1 %v3431_v15  ;;  %v3452_v32 = vpack.c.bf16 %v336_v29, %v332_v27  ;;  %v3454_v33 = vpack.c.bf16 %v346_v31, %v342_v30  ;;  %v331_v34 = vld [vmem:[#allocation6 + $0x40] sm:$0xff]  ;;  %v341_v36 = vld [vmem:[#allocation6 + $0x90] sm:$0xff]  ;;  %v98_v39 = vld [vmem:[%s4134_s0 + $0x18] sm:$0xff] }
  0x55   :  { %2419 = vmatprep.subr.bf16.mxu0 %v3435_v19  ;;  %2455 = vmatprep.subr.bf16.mxu1 %v3437_v20  ;;  %v335_v35 = vld [vmem:[#allocation6 + $0x60] sm:$0xff]  ;;  %v345_v38 = vld [vmem:[#allocation6 + $0xb0] sm:$0xff]  ;;  %v340_v40 = vld [vmem:[#allocation6 + $0x88] sm:$0xff]  ;;  %v3508_v8 = vshrl.u32 %v110_v7, 7 }
  0x56   :  { %2421 = vmatpush1.bf16.msra.mxu0 %v3441_v24  ;;  %v3456_v37 = vpack.c.bf16 %v335_v35, %v331_v34  ;;  %v3464_v41 = vpack.c.bf16 %v345_v38, %v341_v36  ;;  %v344_v42 = vld [vmem:[#allocation6 + $0xa8] sm:$0xff]  ;;  %v339_v43 = vld [vmem:[#allocation6 + $0x80] sm:$0xff]  ;;  %v350_v46 = vld [vmem:[#allocation6 + $0xd8] sm:$0xff] }
  0x57   :  { %2286 = vmatmul.mubr.msk.f32.gmra.mrb[2].mxu1 %vm120_vm0, %v96_v13  ;;  %2423 = vmatprep.subr.bf16.mxu0 %v3452_v32  ;;  %v343_v44 = vld [vmem:[#allocation6 + $0xa0] sm:$0xff]  ;;  %v3467_v45 = vpack.c.bf16 %v344_v42, %v340_v40  ;;  %v354_v47 = vld [vmem:[#allocation6 + $0xf8] sm:$0xff]  ;;  %v349_v48 = vld [vmem:[#allocation6 + $0xd0] sm:$0xff]  ;;  %v116_v9 = vsub.s32 1, %v3508_v8 }
  0x58   :  { %224 = vmatprep.mubr.f32.mxu1 %v4147_v0  ;;  %2457 = vmatpush1.bf16.msra.mxu1 %v3448_v28  ;;  %v3471_v49 = vpack.c.bf16 %v343_v44, %v339_v43  ;;  %v3473_v50 = vpack.c.bf16 %v354_v47, %v350_v46  ;;  %v353_v51 = vld [vmem:[#allocation6 + $0xf0] sm:$0xff]  ;;  %v99_v52 = vld [vmem:[%s4134_s0 + $0x20] sm:$0xff]  ;;  %v348_v53 = vld [vmem:[#allocation6 + $0xc8] sm:$0xff] }
  0x59   :  { %2459 = vmatprep.subr.bf16.mxu1 %v3454_v33  ;;  %v352_v54 = vld [vmem:[#allocation6 + $0xe8] sm:$0xff]  ;;  %v347_v55 = vld [vmem:[#allocation6 + $0xc0] sm:$0xff]  ;;  %v3481_v57 = vpack.c.bf16 %v353_v51, %v349_v48  ;;  %v358_v59 = vld [vmem:[#allocation6 + $0x118] sm:$0xff] }
  0x5a   :  { %2425 = vmatpush1.bf16.msra.mxu0 %v3456_v37  ;;  %v351_v56 = vld [vmem:[#allocation6 + $0xe0] sm:$0xff]  ;;  %v3483_v58 = vpack.c.bf16 %v352_v54, %v348_v53  ;;  %v362_v60 = vld [vmem:[#allocation6 + $0x138] sm:$0xff]  ;;  %v357_v62 = vld [vmem:[#allocation6 + $0x110] sm:$0xff] }
  0x5b   :  { %2287 = vmatmul.mubr.msk.f32.gmra.mrb[4].mxu1 %vm120_vm0, %v97_v26  ;;  %2427 = vmatprep.subr.bf16.mxu0 %v3467_v45  ;;  %v3486_v61 = vpack.c.bf16 %v362_v60, %v358_v59  ;;  %v361_v63 = vld [vmem:[#allocation6 + $0x130] sm:$0xff]  ;;  %v356_v1 = vld [vmem:[#allocation6 + $0x108] sm:$0xff]  ;;  %v3490_v2 = vpack.c.bf16 %v351_v56, %v347_v55  ;;  %v3514_v10 = vld [vmem:[%s4137_s3] sm:$0x3] }
  0x5c   :  { %230 = vmatprep.mubr.f32.mxu1 %v4147_v0  ;;  %2461 = vmatpush1.bf16.msra.mxu1 %v3464_v41  ;;  %v360_v3 = vld [vmem:[#allocation6 + $0x128] sm:$0xff]  ;;  %v3500_v6 = vpack.c.bf16 %v361_v63, %v357_v62  ;;  %v3519_v12 = vrot.slane %v3514_v10, %v116_v9  ;;  %v355_v13 = vld [vmem:[#allocation6 + $0x100] sm:$0xff]  ;;  %v366_v22 = vld [vmem:[#allocation6 + $0x158] sm:$0xff] }
  0x5d   :  { %2463 = vmatprep.subr.bf16.mxu1 %v3473_v50  ;;  %v100_v4 = vld [vmem:[%s4134_s0 + $0x28] sm:$0xff]  ;;  %v3497_v5 = vpack.c.bf16 %v360_v3, %v356_v1  ;;  %v359_v14 = vld [vmem:[#allocation6 + $0x120] sm:$0xff]  ;;  %v370_v23 = vld [vmem:[#allocation6 + $0x178] sm:$0xff] }
  0x5e   :  { %2429 = vmatpush1.bf16.msra.mxu0 %v3471_v49  ;;  %v3523_v17 = vpack.c.bf16 %v359_v14, %v355_v13  ;;  %v364_v25 = vld [vmem:[#allocation6 + $0x148] sm:$0xff]  ;;  %v3529_v26 = vpack.c.bf16 %v370_v23, %v366_v22  ;;  %v101_v27 = vld [vmem:[%s4134_s0 + $0x30] sm:$0xff]  ;;  %v363_v35 = vld [vmem:[#allocation6 + $0x140] sm:$0xff] }
  0x5f   :  { %2288 = vmatmul.mubr.msk.f32.gmra.mrb[6].mxu1 %vm120_vm0, %v98_v39  ;;  %2431 = vmatprep.subr.bf16.mxu0 %v3483_v58  ;;  %v365_v29 = vld [vmem:[#allocation6 + $0x150] sm:$0xff]  ;;  %v368_v34 = vld [vmem:[#allocation6 + $0x168] sm:$0xff]  ;;  %v367_v36 = vld [vmem:[#allocation6 + $0x160] sm:$0xff] }
  0x60   :  { %236 = vmatprep.mubr.f32.mxu1 %v4147_v0  ;;  %2465 = vmatpush1.bf16.msra.mxu1 %v3481_v57  ;;  %v369_v30 = vld [vmem:[#allocation6 + $0x170] sm:$0xff]  ;;  %v3539_v38 = vpack.c.bf16 %v368_v34, %v364_v25  ;;  %v3541_v39 = vpack.c.bf16 %v367_v36, %v363_v35  ;;  %v374_v40 = vld [vmem:[#allocation6 + $0x198] sm:$0xff]  ;;  %v372_v48 = vld [vmem:[#allocation6 + $0x188] sm:$0xff] }
  0x61   :  { %2467 = vmatprep.subr.bf16.mxu1 %v3486_v61  ;;  %v3536_v31 = vpack.c.bf16 %v369_v30, %v365_v29  ;;  %v378_v42 = vld [vmem:[#allocation6 + $0x1b8] sm:$0xff]  ;;  %v373_v46 = vld [vmem:[#allocation6 + $0x190] sm:$0xff]  ;;  %v371_v53 = vld [vmem:[#allocation6 + $0x180] sm:$0xff] }
  0x62   :  { %2433 = vmatpush1.bf16.msra.mxu0 %v3490_v2  ;;  %v102_v43 = vld [vmem:[%s4134_s0 + $0x38] sm:$0xff]  ;;  %v3548_v44 = vpack.c.bf16 %v378_v42, %v374_v40  ;;  %v377_v47 = vld [vmem:[#allocation6 + $0x1b0] sm:$0xff]  ;;  %v375_v54 = vld [vmem:[#allocation6 + $0x1a0] sm:$0xff] }
  0x63   :  { %2289 = vmatmul.mubr.msk.f32.gmra.mrb[8].mxu1 %vm120_vm0, %v99_v52  ;;  %2435 = vmatprep.subr.bf16.mxu0 %v3497_v5  ;;  %v3551_v51 = vpack.c.bf16 %v377_v47, %v373_v46  ;;  %v376_v52 = vld [vmem:[#allocation6 + $0x1a8] sm:$0xff]  ;;  %v3557_v56 = vpack.c.bf16 %v375_v54, %v371_v53  ;;  %v103_v59 = vld [vmem:[%s4134_s0 + $0x40] sm:$0xff]  ;;  %v382_v60 = vld [vmem:[#allocation6 + $0x1d8] sm:$0xff]  ;;  %s3301_s0 = smov 64  }
  0x64   :  { %242 = vmatprep.mubr.f32.mxu1 %v4147_v0  ;;  %2469 = vmatpush1.bf16.msra.mxu1 %v3500_v6  ;;  %v3555_v55 = vpack.c.bf16 %v376_v52, %v372_v48  ;;  %v386_v62 = vld [vmem:[#allocation6 + $0x1f8] sm:$0xff]  ;;  %v380_v1 = vld [vmem:[#allocation6 + $0x1c8] sm:$0xff]  ;;  %v385_v13 = vld [vmem:[#allocation6 + $0x1f0] sm:$0xff] }
  0x65   :  { %2471 = vmatprep.subr.bf16.mxu1 %v3529_v26  ;;  %v3563_v63 = vpack.c.bf16 %v386_v62, %v382_v60  ;;  %v384_v3 = vld [vmem:[#allocation6 + $0x1e8] sm:$0xff]  ;;  %v379_v14 = vld [vmem:[#allocation6 + $0x1c0] sm:$0xff] }
  0x66   :  { %2437 = vmatpush1.bf16.msra.mxu0 %v3523_v17  ;;  %v3567_v7 = vpack.c.bf16 %v384_v3, %v380_v1 }
  0x67   :  { %2290 = vmatmul.mubr.msk.f32.gmra.mrb[10].mxu1 %vm120_vm0, %v100_v4  ;;  %2439 = vmatprep.subr.bf16.mxu0 %v3539_v38  ;;  %v381_v4 = vld [vmem:[#allocation6 + $0x1d0] sm:$0xff] }
  0x68   :  { %248 = vmatprep.mubr.f32.mxu1 %v4147_v0  ;;  %2473 = vmatpush1.bf16.msra.mxu1 %v3536_v31  ;;  %v3571_v22 = vpack.c.bf16 %v385_v13, %v381_v4 }
  0x69   :  { %2475 = vmatprep.subr.bf16.mxu1 %v3548_v44 }
  0x6a   :  { %2441 = vmatpush1.bf16.msra.mxu0 %v3541_v39 }
  0x6b   :  { %2291 = vmatmul.mubr.msk.f32.gmra.mrb[12].mxu1 %vm120_vm0, %v101_v27  ;;  %2443 = vmatprep.subr.bf16.mxu0 %v3555_v55  ;;  %v112_v27 = vsub.s32 0, %v3508_v8 }
  0x6c   :  { %254 = vmatprep.mubr.f32.mxu1 %v4147_v0  ;;  %2477 = vmatpush1.bf16.msra.mxu1 %v3551_v51 }
  0x6d   :  { %2479 = vmatprep.subr.bf16.mxu1 %v3563_v63  ;;  %v3588_v29 = vrot.slane %v3514_v10, %v112_v27 }
  0x6e   :  { %2445 = vmatpush1.bf16.msra.mxu0 %v3557_v56 }
  0x6f   :  { %2292 = vmatmul.mubr.msk.f32.gmra.mrb[14].mxu1 %vm120_vm0, %v102_v43  ;;  %2447 = vmatprep.subr.bf16.mxu0 %v3567_v7 }
  0x70   :  { %260 = vmatprep.mubr.f32.mxu1 %v4147_v0  ;;  %2481 = vmatpush1.bf16.msra.mxu1 %v3571_v22 }
  0x71   :  { %2515 = vmatprep.subr.bf16.mxu1 %v3426_v11 }
  0x73   :  { %2293 = vmatmul.mubr.msk.f32.gmra.mrb[16].mxu1 %vm120_vm0, %v103_v59 }
  0x74   :  { %522 = vmatprep.mubr.f32.mxu1 %v4147_v0 }
 0x126   :  { %v3521_v16 = vpop.f32.mrb[0].mxu1 }
 0x127   :  { %v216_v18 = vpop.f32.mrb[1].mxu1  ;;  %v215_v30 = vadd.f32 %v3521_v16, %v3588_v29 }
 0x128   :  { %v3526_v21 = vadd.f32 %v216_v18, %v3519_v12  ;;  %v383_v18 = vld [vmem:[#allocation6 + $0x1e0] sm:$0xff] }
 0x129   :  { %v3574_v23 = vpack.c.bf16 %v383_v18, %v379_v14  ;;  %v2295_v34 = vmul.f32 -1.442695, %v215_v30 }
 0x12a   :  { %2980 = vtanh.f32 %v3526_v21  ;;  %v3592_v35 = vpop.f32.mrb[2].mxu1  ;;  %v2296_v43 = vmul.f32 -1.442695, %v3526_v21 }
 0x12b   :  { %2449 = vmatpush1.bf16.msra.mxu0 %v3574_v23  ;;  %2982 = vpow2.f32 %v2295_v34  ;;  %v3594_v36 = vpop.f32.mrb[3].mxu1 }
 0x12c   :  { %2483 = vmatprep.subr.bf16.mxu0 %v3435_v19  ;;  %2984 = vpow2.f32 %v2296_v43 }
 0x12e   :  { %v3596_v40 = vpop.f32.mrb[4].mxu1 }
 0x12f   :  { %v3598_v42 = vpop.f32.mrb[5].mxu1 }
 0x132   :  { %v3601_v47 = vpop.f32.mrb[6].mxu1 }
 0x133   :  { %v3603_v10 = vpop.f32.mrb[7].mxu1 }
 0x134   :  { %v2981_v25 = vpop.eup %2980 }
 0x135   :  { %315 = vrot.lane.b32.xlu0 %v2981_v25, %s3301_s0  ;;  %v2983_v46 = vpop.eup %2982 }
 0x136   :  { %v307_v48 = vadd.f32 1.0, %v2983_v46  ;;  %v3605_v16 = vpop.f32.mrb[8].mxu1  ;;  %v2985_v59 = vpop.eup %2984  ;;  %v287_v46 = vld [vmem:[%s4139_s5] sm:$0x3] }
 0x137   :  { %v3607_v52 = vpop.f32.mrb[9].mxu1  ;;  %v308_v60 = vadd.f32 1.0, %v2985_v59  ;;  %v223_v59 = vadd.f32 %v3594_v36, %v3519_v12  ;;  %v3678_v36 = vrot.slane %v287_v46, %v112_v27 }
 0x138   :  { %2986 = vrcp.f32 %v307_v48  ;;  %v221_v48 = vadd.f32 %v3592_v35, %v3588_v29 }
 0x139   :  { %2988 = vrcp.f32 %v308_v60 }
 0x13a   :  { %v3609_v53 = vpop.f32.mrb[10].mxu1 }
 0x13b   :  { %v3611_v54 = vpop.f32.mrb[11].mxu1 }
 0x13e   :  { %v3652_v14 = vpop.f32.mrb[12].mxu1 }
 0x13f   :  { %v3654_v18 = vpop.f32.mrb[13].mxu1 }
 0x142   :  { %v2987_v62 = vpop.eup %2986  ;;  %v3656_v25 = vpop.f32.mrb[14].mxu1 }
 0x143   :  { %v2989_v3 = vpop.eup %2988  ;;  %4150 = vst [vmem:[#allocation16_spill] sm:$0xff] %v3656_v25  ;;  %v3658_v30 = vpop.f32.mrb[15].mxu1 }
 0x144   :  { %4151 = vst [vmem:[#allocation17_spill] sm:$0xff] %v3658_v30 }
 0x146   :  { %v262_v34 = vpop.f32.mrb[16].mxu1 }
 0x147   :  { %v264_v43 = vpop.f32.mrb[17].mxu1 }
 0x1a7   :  { %v316_v21 = vpop.permute.xlu0 %315 }
 0x1a8   :  { %v3613_v1 = vmul.f32 %v2987_v62, %v316_v21 }
 0x1aa   :  { %2990 = vtanh.f32 %v3613_v1 }
 0x1b4   :  { %v2991_v4 = vpop.eup %2990 }
 0x1b5   :  { %v320_v13 = vmul.f32 %v2991_v4, %v2989_v3  ;;  %v3669_v4 = vrot.slane %v287_v46, %v116_v9 }
 0x1b7   :  { %2297 = vmatmul.mubr.msk.f32.vlgmr.msra.gmra.mrb[0].mxu0 %vm321_vm1, %v320_v13  ;;  %2298 = vmatmul.mubr.msk.f32.vlgmr.msra.gmra.mrb[18].mxu1 %vm321_vm1, %v320_v13 }
 0x1b8   :  { %2485 = vmatpush1.bf16.msra.mxu0 %v3441_v24  ;;  %2517 = vmatpush1.bf16.msra.mxu1 %v3431_v15 }
 0x1b9   :  { %2487 = vmatprep.subr.bf16.mxu0 %v3452_v32  ;;  %2519 = vmatprep.subr.bf16.mxu1 %v3437_v20 }
 0x1ba   :  { %678 = vmatprep.mubr.f32.mxu0 %v4147_v0  ;;  %749 = vmatprep.mubr.f32.mxu1 %v4147_v0 }
 0x1bc   :  { %2489 = vmatpush1.bf16.msra.mxu0 %v3456_v37  ;;  %2521 = vmatpush1.bf16.msra.mxu1 %v3448_v28 }
 0x1bd   :  { %2491 = vmatprep.subr.bf16.mxu0 %v3467_v45  ;;  %2523 = vmatprep.subr.bf16.mxu1 %v3454_v33 }
 0x1c0   :  { %2493 = vmatpush1.bf16.msra.mxu0 %v3471_v49  ;;  %2525 = vmatpush1.bf16.msra.mxu1 %v3464_v41 }
 0x1c1   :  { %2495 = vmatprep.subr.bf16.mxu0 %v3483_v58  ;;  %2527 = vmatprep.subr.bf16.mxu1 %v3473_v50 }
 0x1c4   :  { %2497 = vmatpush1.bf16.msra.mxu0 %v3490_v2  ;;  %2529 = vmatpush1.bf16.msra.mxu1 %v3481_v57 }
 0x1c5   :  { %2499 = vmatprep.subr.bf16.mxu0 %v3497_v5  ;;  %2531 = vmatprep.subr.bf16.mxu1 %v3486_v61 }
 0x1c8   :  { %2501 = vmatpush1.bf16.msra.mxu0 %v3523_v17  ;;  %2533 = vmatpush1.bf16.msra.mxu1 %v3500_v6 }
 0x1c9   :  { %2503 = vmatprep.subr.bf16.mxu0 %v3539_v38  ;;  %2535 = vmatprep.subr.bf16.mxu1 %v3529_v26 }
 0x1cc   :  { %2505 = vmatpush1.bf16.msra.mxu0 %v3541_v39  ;;  %2537 = vmatpush1.bf16.msra.mxu1 %v3536_v31 }
 0x1cd   :  { %2507 = vmatprep.subr.bf16.mxu0 %v3555_v55  ;;  %2539 = vmatprep.subr.bf16.mxu1 %v3548_v44 }
 0x1d0   :  { %2509 = vmatpush1.bf16.msra.mxu0 %v3557_v56  ;;  %2541 = vmatpush1.bf16.msra.mxu1 %v3551_v51 }
 0x1d1   :  { %2511 = vmatprep.subr.bf16.mxu0 %v3567_v7  ;;  %2543 = vmatprep.subr.bf16.mxu1 %v3563_v63 }
 0x1d4   :  { %2513 = vmatpush1.bf16.msra.mxu0 %v3574_v23  ;;  %2545 = vmatpush1.bf16.msra.mxu1 %v3571_v22 }
 0x1d5   :  { %2547 = vmatprep.subr.bf16.mxu0 %v3435_v19  ;;  %2579 = vmatprep.subr.bf16.mxu1 %v3426_v11 }
 0x28a   :  { %v453_v60 = vpop.f32.mrb[0].mxu0  ;;  %v524_v62 = vpop.f32.mrb[18].mxu1 }
 0x28b   :  { %v573_v21 = vadd.f32 %v453_v60, %v221_v48  ;;  %v455_v3 = vpop.f32.mrb[1].mxu0  ;;  %v526_v13 = vpop.f32.mrb[19].mxu1  ;;  %v529_v9 = vadd.f32 %v524_v62, %v3678_v36 }
 0x28c   :  { %v574_v34 = vadd.f32 %v455_v3, %v223_v59  ;;  %v530_v43 = vadd.f32 %v526_v13, %v3669_v4 }
 0x28d   :  { %v2299_v48 = vmul.f32 -1.442695, %v529_v9  ;;  %v2301_v59 = vmul.f32 -1.442695, %v573_v21 }
 0x28e   :  { %2992 = vtanh.f32 %v574_v34 }
 0x28f   :  { %2994 = vtanh.f32 %v530_v43 }
 0x290   :  { %2996 = vpow2.f32 %v2299_v48 }
 0x291   :  { %2998 = vpow2.f32 %v2301_v59 }
 0x298   :  { %v2993_v0 = vpop.eup %2992 }
 0x299   :  { %594 = vrot.lane.b32.xlu1 %v2993_v0, %s3301_s0  ;;  %v2995_v35 = vpop.eup %2994 }
 0x29a   :  { %546 = vrot.lane.b32.xlu0 %v2995_v35, %s3301_s0  ;;  %v2997_v60 = vpop.eup %2996 }
 0x29b   :  { %v537_v3 = vadd.f32 1.0, %v2997_v60  ;;  %v2999_v13 = vpop.eup %2998 }
 0x29c   :  { %v581_v0 = vadd.f32 1.0, %v2999_v13 }
 0x29d   :  { %3000 = vrcp.f32 %v537_v3  ;;  %v2300_v3 = vmul.f32 -1.442695, %v530_v43 }
 0x29e   :  { %589 = vrot.lane.b32.xlu0 %v3613_v1, %s3301_s0  ;;  %3002 = vrcp.f32 %v581_v0 }
 0x2a7   :  { %v3001_v35 = vpop.eup %3000 }
 0x2a8   :  { %v3003_v8 = vpop.eup %3002  ;;  %v544_v46 = vmul.f32 0.0, %v3001_v35 }
 0x30b   :  { %v595_v1 = vpop.permute.xlu1 %594 }
 0x30c   :  { %v547_v30 = vpop.permute.xlu0 %546  ;;  %v597_v27 = vmul.f32 %v3003_v8, %v595_v1 }
 0x30d   :  { %v549_v25 = vmul.f32 %v3001_v35, %v547_v30 }
 0x30f   :  { %551 = vrot.lane.b32.xlu1 %v549_v25, %s3301_s0 }
 0x310   :  { %v590_v62 = vpop.permute.xlu0 %589 }
 0x311   :  { %v592_v48 = vmul.f32 %v3003_v8, %v590_v62 }
 0x313   :  { %599 = vrot.lane.b32.xlu1 %v597_v27, %s3301_s0  ;;  %v2302_v27 = vmul.f32 -1.442695, %v574_v34  ;;  %v4153_v34 = vmov 0.0  }
 0x381   :  { %v552_v21 = vpop.permute.xlu1 %551 }
 0x382   :  { %v3683_v9 = vadd.f32 %v552_v21, %v544_v46 }
 0x384   :  { %3004 = vtanh.f32 %v3683_v9 }
 0x385   :  { %v600_v59 = vpop.permute.xlu1 %599 }
 0x386   :  { %v3686_v60 = vadd.f32 %v600_v59, %v592_v48 }
 0x388   :  { %3006 = vtanh.f32 %v3686_v60 }
 0x389   :  { %3008 = vpow2.f32 %v2300_v3  ;;  %v229_v3 = vadd.f32 %v3598_v42, %v3519_v12 }
 0x38e   :  { %v3005_v30 = vpop.eup %3004 }
 0x38f   :  { %557 = vrot.lane.b32.xlu0 %v3005_v30, %s3301_s0 }
 0x392   :  { %v3007_v25 = vpop.eup %3006 }
 0x393   :  { %605 = vrot.lane.b32.xlu1 %v3007_v25, %s3301_s0  ;;  %v3009_v13 = vpop.eup %3008  ;;  %v227_v25 = vadd.f32 %v3596_v40, %v3588_v29 }
 0x394   :  { %v538_v0 = vadd.f32 1.0, %v3009_v13 }
 0x396   :  { %3010 = vrcp.f32 %v538_v0 }
 0x397   :  { %3012 = vpow2.f32 %v2302_v27 }
 0x3a0   :  { %v3011_v35 = vpop.eup %3010 }
 0x3a1   :  { %v3013_v46 = vpop.eup %3012 }
 0x3a2   :  { %v582_v62 = vadd.f32 1.0, %v3013_v46 }
 0x3a4   :  { %3014 = vrcp.f32 %v582_v62 }
 0x3ae   :  { %v3015_v48 = vpop.eup %3014 }
 0x401   :  { %v558_v1 = vpop.permute.xlu0 %557 }
 0x402   :  { %v3691_v8 = vmul.f32 %v3011_v35, %v558_v1 }
 0x404   :  { %4152 = vst [vmem:[#allocation18_spill] sm:$0xff] %v3691_v8  ;;  %610 = vrot.lane.b32.xlu0 %v3691_v8, %s3301_s0 }
 0x405   :  { %v606_v21 = vpop.permute.xlu1 %605 }
 0x406   :  { %v608_v59 = vmul.f32 %v3015_v48, %v606_v21 }
 0x476   :  { %v611_v43 = vpop.permute.xlu0 %610 }
 0x477   :  { %v613_v30 = vsel %vm321_vm1, %v608_v59, %v611_v43 }
 0x478   :  { %679 = vmatmul.mubr.f32.vlgmr.msra.gmra.mrb[2].mxu0 %v613_v30  ;;  %750 = vmatmul.mubr.f32.vlgmr.msra.gmra.mrb[20].mxu1 %v613_v30 }
 0x479   :  { %2549 = vmatpush1.bf16.msra.mxu0 %v3441_v24  ;;  %2581 = vmatpush1.bf16.msra.mxu1 %v3431_v15 }
 0x47a   :  { %2551 = vmatprep.subr.bf16.mxu0 %v3452_v32  ;;  %2583 = vmatprep.subr.bf16.mxu1 %v3437_v20 }
 0x47b   :  { %901 = vmatprep.mubr.f32.mxu0 %v4153_v34  ;;  %972 = vmatprep.mubr.f32.mxu1 %v4153_v34 }
 0x47d   :  { %2553 = vmatpush1.bf16.msra.mxu0 %v3456_v37  ;;  %2585 = vmatpush1.bf16.msra.mxu1 %v3448_v28 }
 0x47e   :  { %2555 = vmatprep.subr.bf16.mxu0 %v3467_v45  ;;  %2587 = vmatprep.subr.bf16.mxu1 %v3454_v33 }
 0x481   :  { %2557 = vmatpush1.bf16.msra.mxu0 %v3471_v49  ;;  %2589 = vmatpush1.bf16.msra.mxu1 %v3464_v41 }
 0x482   :  { %2559 = vmatprep.subr.bf16.mxu0 %v3483_v58  ;;  %2591 = vmatprep.subr.bf16.mxu1 %v3473_v50 }
 0x485   :  { %2561 = vmatpush1.bf16.msra.mxu0 %v3490_v2  ;;  %2593 = vmatpush1.bf16.msra.mxu1 %v3481_v57 }
 0x486   :  { %2563 = vmatprep.subr.bf16.mxu0 %v3497_v5  ;;  %2595 = vmatprep.subr.bf16.mxu1 %v3486_v61 }
 0x489   :  { %2565 = vmatpush1.bf16.msra.mxu0 %v3523_v17  ;;  %2597 = vmatpush1.bf16.msra.mxu1 %v3500_v6 }
 0x48a   :  { %2567 = vmatprep.subr.bf16.mxu0 %v3539_v38  ;;  %2599 = vmatprep.subr.bf16.mxu1 %v3529_v26 }
 0x48d   :  { %2569 = vmatpush1.bf16.msra.mxu0 %v3541_v39  ;;  %2601 = vmatpush1.bf16.msra.mxu1 %v3536_v31 }
 0x48e   :  { %2571 = vmatprep.subr.bf16.mxu0 %v3555_v55  ;;  %2603 = vmatprep.subr.bf16.mxu1 %v3548_v44 }
 0x491   :  { %2573 = vmatpush1.bf16.msra.mxu0 %v3557_v56  ;;  %2605 = vmatpush1.bf16.msra.mxu1 %v3551_v51 }
 0x492   :  { %2575 = vmatprep.subr.bf16.mxu0 %v3567_v7  ;;  %2607 = vmatprep.subr.bf16.mxu1 %v3563_v63 }
 0x495   :  { %2577 = vmatpush1.bf16.msra.mxu0 %v3574_v23  ;;  %2609 = vmatpush1.bf16.msra.mxu1 %v3571_v22 }
 0x496   :  { %2611 = vmatprep.subr.bf16.mxu0 %v3435_v19  ;;  %2643 = vmatprep.subr.bf16.mxu1 %v3426_v11 }
 0x54b   :  { %v680_v13 = vpop.f32.mrb[2].mxu0  ;;  %v751_v0 = vpop.f32.mrb[20].mxu1 }
 0x54c   :  { %v800_v35 = vadd.f32 %v680_v13, %v227_v25  ;;  %v682_v1 = vpop.f32.mrb[3].mxu0  ;;  %v753_v27 = vpop.f32.mrb[21].mxu1  ;;  %v756_v59 = vadd.f32 %v751_v0, %v3678_v36 }
 0x54d   :  { %v801_v46 = vadd.f32 %v682_v1, %v229_v3  ;;  %v757_v62 = vadd.f32 %v753_v27, %v3669_v4 }
 0x54e   :  { %v2305_v40 = vmul.f32 -1.442695, %v800_v35  ;;  %v2303_v42 = vmul.f32 -1.442695, %v756_v59 }
 0x54f   :  { %3016 = vtanh.f32 %v801_v46 }
 0x550   :  { %3018 = vtanh.f32 %v757_v62 }
 0x551   :  { %3020 = vpow2.f32 %v2305_v40 }
 0x552   :  { %3022 = vpow2.f32 %v2303_v42 }
 0x559   :  { %v3017_v21 = vpop.eup %3016 }
 0x55a   :  { %817 = vrot.lane.b32.xlu0 %v3017_v21, %s3301_s0  ;;  %v3019_v48 = vpop.eup %3018 }
 0x55b   :  { %773 = vrot.lane.b32.xlu1 %v3019_v48, %s3301_s0  ;;  %v3021_v43 = vpop.eup %3020 }
 0x55c   :  { %v808_v30 = vadd.f32 1.0, %v3021_v43  ;;  %v3023_v25 = vpop.eup %3022 }
 0x55d   :  { %v764_v3 = vadd.f32 1.0, %v3023_v25  ;;  %v2304_v25 = vmul.f32 -1.442695, %v757_v62 }
 0x55e   :  { %3024 = vrcp.f32 %v808_v30 }
 0x55f   :  { %3026 = vrcp.f32 %v764_v3 }
 0x568   :  { %v3025_v13 = vpop.eup %3024 }
 0x569   :  { %v3027_v21 = vpop.eup %3026  ;;  %v815_v0 = vmul.f32 %v3025_v13, %v3686_v60 }
 0x56a   :  { %v771_v59 = vmul.f32 %v3027_v21, %v3683_v9  ;;  %v2306_v9 = vmul.f32 -1.442695, %v801_v46  ;;  %v233_v46 = vadd.f32 %v3601_v47, %v3588_v29 }
 0x5cc   :  { %v818_v1 = vpop.permute.xlu0 %817 }
 0x5cd   :  { %v820_v27 = vmul.f32 %v3025_v13, %v818_v1  ;;  %v774_v8 = vpop.permute.xlu1 %773 }
 0x5ce   :  { %v776_v48 = vmul.f32 %v3027_v21, %v774_v8 }
 0x5cf   :  { %822 = vrot.lane.b32.xlu0 %v820_v27, %s3301_s0 }
 0x5d0   :  { %778 = vrot.lane.b32.xlu1 %v776_v48, %s3301_s0 }
 0x641   :  { %v823_v35 = vpop.permute.xlu0 %822 }
 0x642   :  { %v3741_v40 = vadd.f32 %v823_v35, %v815_v0  ;;  %v779_v42 = vpop.permute.xlu1 %778 }
 0x643   :  { %v3745_v43 = vadd.f32 %v779_v42, %v771_v59 }
 0x644   :  { %3028 = vtanh.f32 %v3741_v40 }
 0x645   :  { %3030 = vtanh.f32 %v3745_v43 }
 0x646   :  { %3032 = vpow2.f32 %v2304_v25 }
 0x64e   :  { %v3029_v30 = vpop.eup %3028 }
 0x64f   :  { %828 = vrot.lane.b32.xlu0 %v3029_v30, %s3301_s0  ;;  %v3031_v8 = vpop.eup %3030  ;;  %v235_v30 = vadd.f32 %v3603_v10, %v3519_v12 }
 0x650   :  { %784 = vrot.lane.b32.xlu1 %v3031_v8, %s3301_s0  ;;  %v3033_v60 = vpop.eup %3032 }
 0x651   :  { %v765_v3 = vadd.f32 1.0, %v3033_v60 }
 0x653   :  { %3034 = vrcp.f32 %v765_v3 }
 0x654   :  { %3036 = vpow2.f32 %v2306_v9 }
 0x65d   :  { %v3035_v13 = vpop.eup %3034 }
 0x65e   :  { %v3037_v21 = vpop.eup %3036 }
 0x65f   :  { %v809_v48 = vadd.f32 1.0, %v3037_v21 }
 0x661   :  { %3038 = vrcp.f32 %v809_v48 }
 0x66b   :  { %v3039_v35 = vpop.eup %3038 }
 0x6c1   :  { %v829_v0 = vpop.permute.xlu0 %828 }
 0x6c2   :  { %v785_v1 = vpop.permute.xlu1 %784  ;;  %v831_v59 = vmul.f32 %v3039_v35, %v829_v0 }
 0x6c3   :  { %v3750_v27 = vmul.f32 %v3035_v13, %v785_v1 }
 0x6c5   :  { %833 = vrot.lane.b32.xlu1 %v3750_v27, %s3301_s0 }
 0x737   :  { %v834_v62 = vpop.permute.xlu1 %833 }
 0x738   :  { %v836_v42 = vsel %vm321_vm1, %v831_v59, %v834_v62 }
 0x739   :  { %902 = vmatmul.mubr.f32.vlgmr.msra.gmra.mrb[4].mxu0 %v836_v42  ;;  %973 = vmatmul.mubr.f32.vlgmr.msra.gmra.mrb[22].mxu1 %v836_v42 }
 0x73a   :  { %2613 = vmatpush1.bf16.msra.mxu0 %v3441_v24  ;;  %2645 = vmatpush1.bf16.msra.mxu1 %v3431_v15 }
 0x73b   :  { %2615 = vmatprep.subr.bf16.mxu0 %v3452_v32  ;;  %2647 = vmatprep.subr.bf16.mxu1 %v3437_v20 }
 0x73c   :  { %1124 = vmatprep.mubr.f32.mxu0 %v4153_v34  ;;  %1195 = vmatprep.mubr.f32.mxu1 %v4153_v34 }
 0x73e   :  { %2617 = vmatpush1.bf16.msra.mxu0 %v3456_v37  ;;  %2649 = vmatpush1.bf16.msra.mxu1 %v3448_v28 }
 0x73f   :  { %2619 = vmatprep.subr.bf16.mxu0 %v3467_v45  ;;  %2651 = vmatprep.subr.bf16.mxu1 %v3454_v33 }
 0x742   :  { %2621 = vmatpush1.bf16.msra.mxu0 %v3471_v49  ;;  %2653 = vmatpush1.bf16.msra.mxu1 %v3464_v41 }
 0x743   :  { %2623 = vmatprep.subr.bf16.mxu0 %v3483_v58  ;;  %2655 = vmatprep.subr.bf16.mxu1 %v3473_v50 }
 0x746   :  { %2625 = vmatpush1.bf16.msra.mxu0 %v3490_v2  ;;  %2657 = vmatpush1.bf16.msra.mxu1 %v3481_v57 }
 0x747   :  { %2627 = vmatprep.subr.bf16.mxu0 %v3497_v5  ;;  %2659 = vmatprep.subr.bf16.mxu1 %v3486_v61 }
 0x74a   :  { %2629 = vmatpush1.bf16.msra.mxu0 %v3523_v17  ;;  %2661 = vmatpush1.bf16.msra.mxu1 %v3500_v6 }
 0x74b   :  { %2631 = vmatprep.subr.bf16.mxu0 %v3539_v38  ;;  %2663 = vmatprep.subr.bf16.mxu1 %v3529_v26 }
 0x74e   :  { %2633 = vmatpush1.bf16.msra.mxu0 %v3541_v39  ;;  %2665 = vmatpush1.bf16.msra.mxu1 %v3536_v31 }
 0x74f   :  { %2635 = vmatprep.subr.bf16.mxu0 %v3555_v55  ;;  %2667 = vmatprep.subr.bf16.mxu1 %v3548_v44 }
 0x752   :  { %2637 = vmatpush1.bf16.msra.mxu0 %v3557_v56  ;;  %2669 = vmatpush1.bf16.msra.mxu1 %v3551_v51 }
 0x753   :  { %2639 = vmatprep.subr.bf16.mxu0 %v3567_v7  ;;  %2671 = vmatprep.subr.bf16.mxu1 %v3563_v63 }
 0x756   :  { %2641 = vmatpush1.bf16.msra.mxu0 %v3574_v23  ;;  %2673 = vmatpush1.bf16.msra.mxu1 %v3571_v22 }
 0x757   :  { %2675 = vmatprep.subr.bf16.mxu0 %v3435_v19  ;;  %2707 = vmatprep.subr.bf16.mxu1 %v3426_v11 }
 0x80c   :  { %v903_v8 = vpop.f32.mrb[4].mxu0  ;;  %v974_v25 = vpop.f32.mrb[22].mxu1 }
 0x80d   :  { %v1023_v60 = vadd.f32 %v903_v8, %v233_v46  ;;  %v905_v3 = vpop.f32.mrb[5].mxu0  ;;  %v976_v13 = vpop.f32.mrb[23].mxu1  ;;  %v979_v0 = vadd.f32 %v974_v25, %v3678_v36 }
 0x80e   :  { %v1024_v1 = vadd.f32 %v905_v3, %v235_v30  ;;  %v980_v9 = vadd.f32 %v976_v13, %v3669_v4 }
 0x80f   :  { %v2309_v47 = vmul.f32 -1.442695, %v1023_v60  ;;  %v2307_v10 = vmul.f32 -1.442695, %v979_v0 }
 0x810   :  { %3040 = vtanh.f32 %v1024_v1 }
 0x811   :  { %3042 = vtanh.f32 %v980_v9 }
 0x812   :  { %3044 = vpow2.f32 %v2309_v47 }
 0x813   :  { %3046 = vpow2.f32 %v2307_v10 }
 0x81a   :  { %v3041_v21 = vpop.eup %3040 }
 0x81b   :  { %1040 = vrot.lane.b32.xlu1 %v3041_v21, %s3301_s0  ;;  %v3043_v48 = vpop.eup %3042 }
 0x81c   :  { %996 = vrot.lane.b32.xlu0 %v3043_v48, %s3301_s0  ;;  %v3045_v35 = vpop.eup %3044 }
 0x81d   :  { %v1031_v59 = vadd.f32 1.0, %v3045_v35  ;;  %v3047_v62 = vpop.eup %3046 }
 0x81e   :  { %v987_v42 = vadd.f32 1.0, %v3047_v62  ;;  %v2308_v62 = vmul.f32 -1.442695, %v980_v9 }
 0x81f   :  { %3048 = vrcp.f32 %v1031_v59 }
 0x820   :  { %3050 = vrcp.f32 %v987_v42 }
 0x829   :  { %v3049_v46 = vpop.eup %3048 }
 0x82a   :  { %v3051_v3 = vpop.eup %3050  ;;  %v1038_v25 = vmul.f32 %v3049_v46, %v3741_v40 }
 0x82b   :  { %v994_v47 = vmul.f32 %v3051_v3, %v3745_v43  ;;  %v2310_v43 = vmul.f32 -1.442695, %v1024_v1  ;;  %v239_v1 = vadd.f32 %v3605_v16, %v3588_v29 }
 0x88d   :  { %v1041_v30 = vpop.permute.xlu1 %1040 }
 0x88e   :  { %v1043_v8 = vmul.f32 %v3049_v46, %v1041_v30  ;;  %v997_v13 = vpop.permute.xlu0 %996 }
 0x88f   :  { %v999_v21 = vmul.f32 %v3051_v3, %v997_v13 }
 0x890   :  { %1045 = vrot.lane.b32.xlu1 %v1043_v8, %s3301_s0 }
 0x891   :  { %1001 = vrot.lane.b32.xlu0 %v999_v21, %s3301_s0 }
 0x902   :  { %v1046_v60 = vpop.permute.xlu1 %1045 }
 0x903   :  { %v3800_v48 = vadd.f32 %v1046_v60, %v1038_v25  ;;  %v1002_v0 = vpop.permute.xlu0 %1001 }
 0x904   :  { %v3804_v10 = vadd.f32 %v1002_v0, %v994_v47  ;;  %v241_v0 = vadd.f32 %v3607_v52, %v3519_v12 }
 0x905   :  { %3052 = vtanh.f32 %v3800_v48 }
 0x906   :  { %3054 = vtanh.f32 %v3804_v10 }
 0x907   :  { %3056 = vpow2.f32 %v2308_v62 }
 0x90f   :  { %v3053_v35 = vpop.eup %3052 }
 0x910   :  { %1051 = vrot.lane.b32.xlu1 %v3053_v35, %s3301_s0  ;;  %v3055_v59 = vpop.eup %3054 }
 0x911   :  { %1007 = vrot.lane.b32.xlu0 %v3055_v59, %s3301_s0  ;;  %v3057_v40 = vpop.eup %3056 }
 0x912   :  { %v988_v42 = vadd.f32 1.0, %v3057_v40 }
 0x914   :  { %3058 = vrcp.f32 %v988_v42 }
 0x915   :  { %3060 = vpow2.f32 %v2310_v43 }
 0x91e   :  { %v3059_v46 = vpop.eup %3058 }
 0x91f   :  { %v3061_v3 = vpop.eup %3060 }
 0x920   :  { %v1032_v13 = vadd.f32 1.0, %v3061_v3 }
 0x922   :  { %3062 = vrcp.f32 %v1032_v13 }
 0x92c   :  { %v3063_v25 = vpop.eup %3062 }
 0x982   :  { %v1052_v21 = vpop.permute.xlu1 %1051 }
 0x983   :  { %v1008_v30 = vpop.permute.xlu0 %1007  ;;  %v1054_v60 = vmul.f32 %v3063_v25, %v1052_v21 }
 0x984   :  { %v3809_v8 = vmul.f32 %v3059_v46, %v1008_v30 }
 0x986   :  { %1056 = vrot.lane.b32.xlu0 %v3809_v8, %s3301_s0 }
 0x9f8   :  { %v1057_v9 = vpop.permute.xlu0 %1056 }
 0x9f9   :  { %v1059_v47 = vsel %vm321_vm1, %v1054_v60, %v1057_v9 }
 0x9fa   :  { %1125 = vmatmul.mubr.f32.vlgmr.msra.gmra.mrb[6].mxu0 %v1059_v47  ;;  %1196 = vmatmul.mubr.f32.vlgmr.msra.gmra.mrb[24].mxu1 %v1059_v47 }
 0x9fb   :  { %2677 = vmatpush1.bf16.msra.mxu0 %v3441_v24  ;;  %2709 = vmatpush1.bf16.msra.mxu1 %v3431_v15 }
 0x9fc   :  { %2679 = vmatprep.subr.bf16.mxu0 %v3452_v32  ;;  %2711 = vmatprep.subr.bf16.mxu1 %v3437_v20 }
 0x9fd   :  { %1347 = vmatprep.mubr.f32.mxu0 %v4153_v34  ;;  %1418 = vmatprep.mubr.f32.mxu1 %v4153_v34 }
 0x9ff   :  { %2681 = vmatpush1.bf16.msra.mxu0 %v3456_v37  ;;  %2713 = vmatpush1.bf16.msra.mxu1 %v3448_v28 }
 0xa00   :  { %2683 = vmatprep.subr.bf16.mxu0 %v3467_v45  ;;  %2715 = vmatprep.subr.bf16.mxu1 %v3454_v33 }
 0xa03   :  { %2685 = vmatpush1.bf16.msra.mxu0 %v3471_v49  ;;  %2717 = vmatpush1.bf16.msra.mxu1 %v3464_v41 }
 0xa04   :  { %2687 = vmatprep.subr.bf16.mxu0 %v3483_v58  ;;  %2719 = vmatprep.subr.bf16.mxu1 %v3473_v50 }
 0xa07   :  { %2689 = vmatpush1.bf16.msra.mxu0 %v3490_v2  ;;  %2721 = vmatpush1.bf16.msra.mxu1 %v3481_v57 }
 0xa08   :  { %2691 = vmatprep.subr.bf16.mxu0 %v3497_v5  ;;  %2723 = vmatprep.subr.bf16.mxu1 %v3486_v61 }
 0xa0b   :  { %2693 = vmatpush1.bf16.msra.mxu0 %v3523_v17  ;;  %2725 = vmatpush1.bf16.msra.mxu1 %v3500_v6 }
 0xa0c   :  { %2695 = vmatprep.subr.bf16.mxu0 %v3539_v38  ;;  %2727 = vmatprep.subr.bf16.mxu1 %v3529_v26 }
 0xa0f   :  { %2697 = vmatpush1.bf16.msra.mxu0 %v3541_v39  ;;  %2729 = vmatpush1.bf16.msra.mxu1 %v3536_v31 }
 0xa10   :  { %2699 = vmatprep.subr.bf16.mxu0 %v3555_v55  ;;  %2731 = vmatprep.subr.bf16.mxu1 %v3548_v44 }
 0xa13   :  { %2701 = vmatpush1.bf16.msra.mxu0 %v3557_v56  ;;  %2733 = vmatpush1.bf16.msra.mxu1 %v3551_v51 }
 0xa14   :  { %2703 = vmatprep.subr.bf16.mxu0 %v3567_v7  ;;  %2735 = vmatprep.subr.bf16.mxu1 %v3563_v63 }
 0xa17   :  { %2705 = vmatpush1.bf16.msra.mxu0 %v3574_v23  ;;  %2737 = vmatpush1.bf16.msra.mxu1 %v3571_v22 }
 0xa18   :  { %2739 = vmatprep.subr.bf16.mxu0 %v3435_v19  ;;  %2771 = vmatprep.subr.bf16.mxu1 %v3426_v11 }
 0xacd   :  { %v1126_v35 = vpop.f32.mrb[6].mxu0  ;;  %v1197_v59 = vpop.f32.mrb[24].mxu1 }
 0xace   :  { %v1246_v62 = vadd.f32 %v1126_v35, %v239_v1  ;;  %v1128_v40 = vpop.f32.mrb[7].mxu0  ;;  %v1199_v42 = vpop.f32.mrb[25].mxu1  ;;  %v1202_v13 = vadd.f32 %v1197_v59, %v3678_v36 }
 0xacf   :  { %v1247_v46 = vadd.f32 %v1128_v40, %v241_v0  ;;  %v1203_v30 = vadd.f32 %v1199_v42, %v3669_v4 }
 0xad0   :  { %v2313_v16 = vmul.f32 -1.442695, %v1246_v62  ;;  %v2311_v52 = vmul.f32 -1.442695, %v1202_v13 }
 0xad1   :  { %3064 = vtanh.f32 %v1247_v46 }
 0xad2   :  { %3066 = vtanh.f32 %v1203_v30 }
 0xad3   :  { %3068 = vpow2.f32 %v2313_v16 }
 0xad4   :  { %3070 = vpow2.f32 %v2311_v52 }
 0xadb   :  { %v3065_v43 = vpop.eup %3064 }
 0xadc   :  { %1263 = vrot.lane.b32.xlu0 %v3065_v43, %s3301_s0  ;;  %v3067_v3 = vpop.eup %3066 }
 0xadd   :  { %1219 = vrot.lane.b32.xlu1 %v3067_v3, %s3301_s0  ;;  %v3069_v21 = vpop.eup %3068 }
 0xade   :  { %v1254_v25 = vadd.f32 1.0, %v3069_v21  ;;  %v3071_v60 = vpop.eup %3070 }
 0xadf   :  { %v1210_v9 = vadd.f32 1.0, %v3071_v60 }
 0xae0   :  { %3072 = vrcp.f32 %v1254_v25  ;;  %v2312_v25 = vmul.f32 -1.442695, %v1203_v30 }
 0xae1   :  { %3074 = vrcp.f32 %v1210_v9 }
 0xaea   :  { %v3073_v47 = vpop.eup %3072 }
 0xaeb   :  { %v3075_v35 = vpop.eup %3074  ;;  %v1261_v59 = vmul.f32 %v3073_v47, %v3800_v48 }
 0xaec   :  { %v1217_v3 = vmul.f32 %v3075_v35, %v3804_v10  ;;  %v2314_v10 = vmul.f32 -1.442695, %v1247_v46  ;;  %v245_v46 = vadd.f32 %v3609_v53, %v3588_v29 }
 0xb4e   :  { %v1264_v1 = vpop.permute.xlu0 %1263 }
 0xb4f   :  { %v1266_v0 = vmul.f32 %v3073_v47, %v1264_v1  ;;  %v1220_v40 = vpop.permute.xlu1 %1219 }
 0xb50   :  { %v1222_v42 = vmul.f32 %v3075_v35, %v1220_v40 }
 0xb51   :  { %1268 = vrot.lane.b32.xlu0 %v1266_v0, %s3301_s0 }
 0xb52   :  { %1224 = vrot.lane.b32.xlu1 %v1222_v42, %s3301_s0 }
 0xbc3   :  { %v1269_v62 = vpop.permute.xlu0 %1268 }
 0xbc4   :  { %v3859_v43 = vadd.f32 %v1269_v62, %v1261_v59  ;;  %v1225_v16 = vpop.permute.xlu1 %1224 }
 0xbc5   :  { %v3863_v13 = vadd.f32 %v1225_v16, %v1217_v3  ;;  %v247_v3 = vadd.f32 %v3611_v54, %v3519_v12 }
 0xbc6   :  { %3076 = vtanh.f32 %v3859_v43 }
 0xbc7   :  { %3078 = vtanh.f32 %v3863_v13 }
 0xbc8   :  { %3080 = vpow2.f32 %v2312_v25 }
 0xbd0   :  { %v3077_v52 = vpop.eup %3076 }
 0xbd1   :  { %1274 = vrot.lane.b32.xlu0 %v3077_v52, %s3301_s0  ;;  %v3079_v21 = vpop.eup %3078 }
 0xbd2   :  { %1230 = vrot.lane.b32.xlu1 %v3079_v21, %s3301_s0  ;;  %v3081_v48 = vpop.eup %3080 }
 0xbd3   :  { %v1211_v60 = vadd.f32 1.0, %v3081_v48 }
 0xbd5   :  { %3082 = vrcp.f32 %v1211_v60 }
 0xbd6   :  { %3084 = vpow2.f32 %v2314_v10 }
 0xbdf   :  { %v3083_v9 = vpop.eup %3082 }
 0xbe0   :  { %v3085_v0 = vpop.eup %3084 }
 0xbe1   :  { %v1255_v35 = vadd.f32 1.0, %v3085_v0 }
 0xbe3   :  { %3086 = vrcp.f32 %v1255_v35 }
 0xbed   :  { %v3087_v42 = vpop.eup %3086 }
 0xc43   :  { %v1275_v40 = vpop.permute.xlu0 %1274 }
 0xc44   :  { %v1231_v47 = vpop.permute.xlu1 %1230  ;;  %v1277_v59 = vmul.f32 %v3087_v42, %v1275_v40 }
 0xc45   :  { %v3868_v1 = vmul.f32 %v3083_v9, %v1231_v47 }
 0xc47   :  { %1279 = vrot.lane.b32.xlu1 %v3868_v1, %s3301_s0 }
 0xcb9   :  { %v1280_v30 = vpop.permute.xlu1 %1279 }
 0xcba   :  { %v1282_v62 = vsel %vm321_vm1, %v1277_v59, %v1280_v30 }
 0xcbb   :  { %1348 = vmatmul.mubr.f32.vlgmr.msra.gmra.mrb[8].mxu0 %v1282_v62  ;;  %1419 = vmatmul.mubr.f32.vlgmr.msra.gmra.mrb[26].mxu1 %v1282_v62 }
 0xcbc   :  { %2741 = vmatpush1.bf16.msra.mxu0 %v3441_v24  ;;  %2773 = vmatpush1.bf16.msra.mxu1 %v3431_v15 }
 0xcbd   :  { %2743 = vmatprep.subr.bf16.mxu0 %v3452_v32  ;;  %2775 = vmatprep.subr.bf16.mxu1 %v3437_v20 }
 0xcbe   :  { %1570 = vmatprep.mubr.f32.mxu0 %v4153_v34  ;;  %1641 = vmatprep.mubr.f32.mxu1 %v4153_v34 }
 0xcc0   :  { %2745 = vmatpush1.bf16.msra.mxu0 %v3456_v37  ;;  %2777 = vmatpush1.bf16.msra.mxu1 %v3448_v28 }
 0xcc1   :  { %2747 = vmatprep.subr.bf16.mxu0 %v3467_v45  ;;  %2779 = vmatprep.subr.bf16.mxu1 %v3454_v33 }
 0xcc4   :  { %2749 = vmatpush1.bf16.msra.mxu0 %v3471_v49  ;;  %2781 = vmatpush1.bf16.msra.mxu1 %v3464_v41 }
 0xcc5   :  { %2751 = vmatprep.subr.bf16.mxu0 %v3483_v58  ;;  %2783 = vmatprep.subr.bf16.mxu1 %v3473_v50 }
 0xcc8   :  { %2753 = vmatpush1.bf16.msra.mxu0 %v3490_v2  ;;  %2785 = vmatpush1.bf16.msra.mxu1 %v3481_v57 }
 0xcc9   :  { %2755 = vmatprep.subr.bf16.mxu0 %v3497_v5  ;;  %2787 = vmatprep.subr.bf16.mxu1 %v3486_v61 }
 0xccc   :  { %2757 = vmatpush1.bf16.msra.mxu0 %v3523_v17  ;;  %2789 = vmatpush1.bf16.msra.mxu1 %v3500_v6 }
 0xccd   :  { %2759 = vmatprep.subr.bf16.mxu0 %v3539_v38  ;;  %2791 = vmatprep.subr.bf16.mxu1 %v3529_v26 }
 0xcd0   :  { %2761 = vmatpush1.bf16.msra.mxu0 %v3541_v39  ;;  %2793 = vmatpush1.bf16.msra.mxu1 %v3536_v31 }
 0xcd1   :  { %2763 = vmatprep.subr.bf16.mxu0 %v3555_v55  ;;  %2795 = vmatprep.subr.bf16.mxu1 %v3548_v44 }
 0xcd4   :  { %2765 = vmatpush1.bf16.msra.mxu0 %v3557_v56  ;;  %2797 = vmatpush1.bf16.msra.mxu1 %v3551_v51 }
 0xcd5   :  { %2767 = vmatprep.subr.bf16.mxu0 %v3567_v7  ;;  %2799 = vmatprep.subr.bf16.mxu1 %v3563_v63 }
 0xcd8   :  { %2769 = vmatpush1.bf16.msra.mxu0 %v3574_v23  ;;  %2801 = vmatpush1.bf16.msra.mxu1 %v3571_v22 }
 0xcd9   :  { %2803 = vmatprep.subr.bf16.mxu0 %v3435_v19  ;;  %2835 = vmatprep.subr.bf16.mxu1 %v3426_v11 }
 0xd8e   :  { %v1349_v16 = vpop.f32.mrb[8].mxu0  ;;  %v1420_v52 = vpop.f32.mrb[26].mxu1 }
 0xd8f   :  { %v1469_v21 = vadd.f32 %v1349_v16, %v245_v46  ;;  %v1351_v25 = vpop.f32.mrb[9].mxu0  ;;  %v1422_v48 = vpop.f32.mrb[27].mxu1  ;;  %v1425_v10 = vadd.f32 %v1420_v52, %v3678_v36 }
 0xd90   :  { %v1470_v60 = vadd.f32 %v1351_v25, %v247_v3  ;;  %v1426_v9 = vadd.f32 %v1422_v48, %v3669_v4 }
 0xd91   :  { %v2317_v53 = vmul.f32 -1.442695, %v1469_v21  ;;  %v2315_v54 = vmul.f32 -1.442695, %v1425_v10 }
 0xd92   :  { %3088 = vtanh.f32 %v1470_v60 }
 0xd93   :  { %3090 = vtanh.f32 %v1426_v9 }
 0xd94   :  { %3092 = vpow2.f32 %v2317_v53 }
 0xd95   :  { %3094 = vpow2.f32 %v2315_v54  ;;  %v2316_v54 = vmul.f32 -1.442695, %v1426_v9 }
 0xd9c   :  { %v3089_v47 = vpop.eup %3088 }
 0xd9d   :  { %1486 = vrot.lane.b32.xlu1 %v3089_v47, %s3301_s0  ;;  %v3091_v19 = vpop.eup %3090 }
 0xd9e   :  { %1442 = vrot.lane.b32.xlu0 %v3091_v19, %s3301_s0  ;;  %v3093_v0 = vpop.eup %3092 }
 0xd9f   :  { %v1477_v35 = vadd.f32 1.0, %v3093_v0  ;;  %v3095_v40 = vpop.eup %3094 }
 0xda0   :  { %v1433_v42 = vadd.f32 1.0, %v3095_v40 }
 0xda1   :  { %3096 = vrcp.f32 %v1477_v35 }
 0xda2   :  { %3098 = vrcp.f32 %v1433_v42 }
 0xdab   :  { %v3097_v59 = vpop.eup %3096 }
 0xdac   :  { %v3099_v46 = vpop.eup %3098  ;;  %v1484_v52 = vmul.f32 %v3097_v59, %v3859_v43 }
 0xdad   :  { %v1440_v48 = vmul.f32 %v3099_v46, %v3863_v13  ;;  %v2318_v13 = vmul.f32 -1.442695, %v1470_v60 }
 0xe0f   :  { %v1487_v30 = vpop.permute.xlu1 %1486 }
 0xe10   :  { %v1489_v62 = vmul.f32 %v3097_v59, %v1487_v30  ;;  %v1443_v3 = vpop.permute.xlu0 %1442 }
 0xe11   :  { %v1445_v16 = vmul.f32 %v3099_v46, %v1443_v3 }
 0xe12   :  { %1491 = vrot.lane.b32.xlu1 %v1489_v62, %s3301_s0 }
 0xe13   :  { %1447 = vrot.lane.b32.xlu0 %v1445_v16, %s3301_s0 }
 0xe84   :  { %v1492_v21 = vpop.permute.xlu1 %1491 }
 0xe85   :  { %v3918_v25 = vadd.f32 %v1492_v21, %v1484_v52  ;;  %v1448_v47 = vpop.permute.xlu0 %1447 }
 0xe86   :  { %v3922_v19 = vadd.f32 %v1448_v47, %v1440_v48 }
 0xe87   :  { %3100 = vtanh.f32 %v3918_v25 }
 0xe88   :  { %3102 = vtanh.f32 %v3922_v19 }
 0xe89   :  { %3104 = vpow2.f32 %v2316_v54 }
 0xe91   :  { %v3101_v53 = vpop.eup %3100 }
 0xe92   :  { %1497 = vrot.lane.b32.xlu1 %v3101_v53, %s3301_s0  ;;  %v3103_v10 = vpop.eup %3102 }
 0xe93   :  { %1453 = vrot.lane.b32.xlu0 %v3103_v10, %s3301_s0  ;;  %v3105_v43 = vpop.eup %3104 }
 0xe94   :  { %v1434_v0 = vadd.f32 1.0, %v3105_v43 }
 0xe96   :  { %3106 = vrcp.f32 %v1434_v0 }
 0xe97   :  { %3108 = vpow2.f32 %v2318_v13 }
 0xea0   :  { %v3107_v35 = vpop.eup %3106 }
 0xea1   :  { %v3109_v59 = vpop.eup %3108 }
 0xea2   :  { %v1478_v30 = vadd.f32 1.0, %v3109_v59 }
 0xea4   :  { %3110 = vrcp.f32 %v1478_v30 }
 0xeae   :  { %v3111_v46 = vpop.eup %3110 }
 0xf04   :  { %v1498_v62 = vpop.permute.xlu1 %1497 }
 0xf05   :  { %v1454_v40 = vpop.permute.xlu0 %1453  ;;  %v1500_v3 = vmul.f32 %v3111_v46, %v1498_v62 }
 0xf06   :  { %v3927_v42 = vmul.f32 %v3107_v35, %v1454_v40 }
 0xf08   :  { %1502 = vrot.lane.b32.xlu0 %v3927_v42, %s3301_s0 }
 0xf7a   :  { %v1503_v9 = vpop.permute.xlu0 %1502 }
 0xf7b   :  { %v1505_v16 = vsel %vm321_vm1, %v1500_v3, %v1503_v9 }
 0xf7c   :  { %1571 = vmatmul.mubr.f32.vlgmr.msra.gmra.mrb[10].mxu0 %v1505_v16  ;;  %1642 = vmatmul.mubr.f32.vlgmr.msra.gmra.mrb[28].mxu1 %v1505_v16 }
 0xf7d   :  { %2805 = vmatpush1.bf16.msra.mxu0 %v3441_v24  ;;  %2837 = vmatpush1.bf16.msra.mxu1 %v3431_v15  ;;  %v251_v24 = vadd.f32 %v3652_v14, %v3588_v29 }
 0xf7e   :  { %2807 = vmatprep.subr.bf16.mxu0 %v3452_v32  ;;  %2839 = vmatprep.subr.bf16.mxu1 %v3437_v20  ;;  %v253_v32 = vadd.f32 %v3654_v18, %v3519_v12 }
 0xf7f   :  { %1793 = vmatprep.mubr.f32.mxu0 %v4153_v34  ;;  %1864 = vmatprep.mubr.f32.mxu1 %v4153_v34 }
 0xf81   :  { %2809 = vmatpush1.bf16.msra.mxu0 %v3456_v37  ;;  %2841 = vmatpush1.bf16.msra.mxu1 %v3448_v28 }
 0xf82   :  { %2811 = vmatprep.subr.bf16.mxu0 %v3467_v45  ;;  %2843 = vmatprep.subr.bf16.mxu1 %v3454_v33 }
 0xf85   :  { %2813 = vmatpush1.bf16.msra.mxu0 %v3471_v49  ;;  %2845 = vmatpush1.bf16.msra.mxu1 %v3464_v41 }
 0xf86   :  { %2815 = vmatprep.subr.bf16.mxu0 %v3483_v58  ;;  %2847 = vmatprep.subr.bf16.mxu1 %v3473_v50 }
 0xf89   :  { %2817 = vmatpush1.bf16.msra.mxu0 %v3490_v2  ;;  %2849 = vmatpush1.bf16.msra.mxu1 %v3481_v57 }
 0xf8a   :  { %2819 = vmatprep.subr.bf16.mxu0 %v3497_v5  ;;  %2851 = vmatprep.subr.bf16.mxu1 %v3486_v61 }
 0xf8d   :  { %2821 = vmatpush1.bf16.msra.mxu0 %v3523_v17  ;;  %2853 = vmatpush1.bf16.msra.mxu1 %v3500_v6 }
 0xf8e   :  { %2823 = vmatprep.subr.bf16.mxu0 %v3539_v38  ;;  %2855 = vmatprep.subr.bf16.mxu1 %v3529_v26 }
 0xf91   :  { %2825 = vmatpush1.bf16.msra.mxu0 %v3541_v39  ;;  %2857 = vmatpush1.bf16.msra.mxu1 %v3536_v31 }
 0xf92   :  { %2827 = vmatprep.subr.bf16.mxu0 %v3555_v55  ;;  %2859 = vmatprep.subr.bf16.mxu1 %v3548_v44 }
 0xf95   :  { %2829 = vmatpush1.bf16.msra.mxu0 %v3557_v56  ;;  %2861 = vmatpush1.bf16.msra.mxu1 %v3551_v51 }
 0xf96   :  { %2831 = vmatprep.subr.bf16.mxu0 %v3567_v7  ;;  %2863 = vmatprep.subr.bf16.mxu1 %v3563_v63 }
 0xf99   :  { %2833 = vmatpush1.bf16.msra.mxu0 %v3574_v23  ;;  %2865 = vmatpush1.bf16.msra.mxu1 %v3571_v22 }
 0xf9a   :  { %2867 = vmatprep.subr.bf16.mxu1 %v3426_v11 }
0x104f   :  { %v1572_v37 = vpop.f32.mrb[10].mxu0  ;;  %v1643_v45 = vpop.f32.mrb[28].mxu1 }
0x1050   :  { %v1692_v49 = vadd.f32 %v1572_v37, %v251_v24  ;;  %v1574_v58 = vpop.f32.mrb[11].mxu0  ;;  %v1645_v2 = vpop.f32.mrb[29].mxu1  ;;  %v1648_v55 = vadd.f32 %v1643_v45, %v3678_v36 }
0x1051   :  { %v1693_v5 = vadd.f32 %v1574_v58, %v253_v32  ;;  %v1649_v17 = vadd.f32 %v1645_v2, %v3669_v4 }
0x1052   :  { %v2321_v39 = vmul.f32 -1.442695, %v1692_v49  ;;  %v2319_v56 = vmul.f32 -1.442695, %v1648_v55 }
0x1053   :  { %3112 = vtanh.f32 %v1693_v5  ;;  %v2320_v30 = vmul.f32 -1.442695, %v1649_v17 }
0x1054   :  { %3114 = vtanh.f32 %v1649_v17 }
0x1055   :  { %3116 = vpow2.f32 %v2321_v39 }
0x1056   :  { %3118 = vpow2.f32 %v2319_v56 }
0x105d   :  { %v3113_v38 = vpop.eup %3112 }
0x105e   :  { %1709 = vrot.lane.b32.xlu0 %v3113_v38, %s3301_s0  ;;  %v3115_v11 = vpop.eup %3114 }
0x105f   :  { %1665 = vrot.lane.b32.xlu1 %v3115_v11, %s3301_s0  ;;  %v3117_v7 = vpop.eup %3116 }
0x1060   :  { %v1700_v23 = vadd.f32 1.0, %v3117_v7  ;;  %v3119_v14 = vpop.eup %3118 }
0x1061   :  { %v1656_v18 = vadd.f32 1.0, %v3119_v14 }
0x1062   :  { %3120 = vrcp.f32 %v1700_v23 }
0x1063   :  { %3122 = vrcp.f32 %v1656_v18 }
0x106c   :  { %v3121_v60 = vpop.eup %3120 }
0x106d   :  { %v3123_v48 = vpop.eup %3122  ;;  %v1707_v10 = vmul.f32 %v3121_v60, %v3918_v25 }
0x106e   :  { %v1663_v0 = vmul.f32 %v3123_v48, %v3922_v19  ;;  %v2322_v19 = vmul.f32 -1.442695, %v1693_v5 }
0x10d0   :  { %v1710_v52 = vpop.permute.xlu0 %1709 }
0x10d1   :  { %v1712_v21 = vmul.f32 %v3121_v60, %v1710_v52  ;;  %v1666_v47 = vpop.permute.xlu1 %1665 }
0x10d2   :  { %v1668_v53 = vmul.f32 %v3123_v48, %v1666_v47 }
0x10d3   :  { %1714 = vrot.lane.b32.xlu0 %v1712_v21, %s3301_s0 }
0x10d4   :  { %1670 = vrot.lane.b32.xlu1 %v1668_v53, %s3301_s0 }
0x1145   :  { %v1715_v54 = vpop.permute.xlu0 %1714 }
0x1146   :  { %v3976_v43 = vadd.f32 %v1715_v54, %v1707_v10  ;;  %v1671_v35 = vpop.permute.xlu1 %1670 }
0x1147   :  { %v3980_v40 = vadd.f32 %v1671_v35, %v1663_v0 }
0x1148   :  { %3124 = vtanh.f32 %v3976_v43 }
0x1149   :  { %3126 = vtanh.f32 %v3980_v40 }
0x114a   :  { %3128 = vpow2.f32 %v2320_v30 }
0x1152   :  { %v3125_v13 = vpop.eup %3124 }
0x1153   :  { %1720 = vrot.lane.b32.xlu0 %v3125_v13, %s3301_s0  ;;  %v3127_v59 = vpop.eup %3126 }
0x1154   :  { %1676 = vrot.lane.b32.xlu1 %v3127_v59, %s3301_s0  ;;  %v3129_v25 = vpop.eup %3128 }
0x1155   :  { %v1657_v62 = vadd.f32 1.0, %v3129_v25 }
0x1157   :  { %3130 = vrcp.f32 %v1657_v62 }
0x1158   :  { %3132 = vpow2.f32 %v2322_v19  ;;  %v3302_v19 = vmov 0  }
0x1159   :  { %2978 = vset.pattern.permute.xlu1 %v3302_v19  ;;  %2979 = vset.pattern.permute.xlu0 %v3302_v19 }
0x1161   :  { %v3131_v46 = vpop.eup %3130 }
0x1162   :  { %v3133_v16 = vpop.eup %3132 }
0x1163   :  { %v1701_v24 = vadd.f32 1.0, %v3133_v16 }
0x1165   :  { %3134 = vrcp.f32 %v1701_v24 }
0x116f   :  { %v3135_v37 = vpop.eup %3134 }
0x11c5   :  { %v1721_v32 = vpop.permute.xlu0 %1720 }
0x11c6   :  { %v1677_v3 = vpop.permute.xlu1 %1676  ;;  %v1723_v45 = vmul.f32 %v3135_v37, %v1721_v32  ;;  %v285_v37 = vld [vmem:[%s4135_s1] sm:$0xff] }
0x11c7   :  { %v3985_v9 = vmul.f32 %v3131_v46, %v1677_v3 }
0x11c9   :  { %1725 = vrot.lane.b32.xlu1 %v3985_v9, %s3301_s0 }
0x123b   :  { %v1726_v49 = vpop.permute.xlu1 %1725 }
0x123c   :  { %v1728_v58 = vsel %vm321_vm1, %v1723_v45, %v1726_v49  ;;  %v2294_v45 = vadd.s32 4294967295, %v285_v37  ;;  %v2170_v37 = vld [vmem:[%s4144_s10 + $0x18] sm:$0xff] }
0x123d   :  { %1794 = vmatmul.mubr.f32.vlgmr.msra.gmra.mrb[12].mxu0 %v1728_v58  ;;  %1865 = vmatmul.mubr.f32.vlgmr.msra.gmra.mrb[30].mxu1 %v1728_v58 }
0x123e   :  { %2869 = vmatpush1.bf16.msra.mxu1 %v3431_v15  ;;  %2016 = vmatprep.mubr.f32.mxu1 %v4153_v34  ;;  %v4154_v15 = vld [vmem:[#allocation16_spill] sm:$0xff]  ;;  %vm561_vm2 = vcmp.eq.s32.totalorder %v2294_v45, 0  ;;  %vm1011_vm3 = vcmp.eq.s32.totalorder %v2294_v45, 2  ;;  %vm1234_vm4 = vcmp.eq.s32.totalorder %v2294_v45, 3  ;;  %vm1680_vm5 = vcmp.eq.s32.totalorder %v2294_v45, 5 }
0x123f   :  { %2871 = vmatprep.subr.bf16.mxu1 %v3437_v20  ;;  %v257_v20 = vadd.f32 %v4154_v15, %v3588_v29  ;;  %v562_v58 = vsel %vm561_vm2, 1, %v3302_v19  ;;  %v1012_v15 = vsel %vm1011_vm3, 1, %v3302_v19  ;;  %vm2055_vm6 = vcmp.eq.s32.totalorder %v2294_v45, 7  ;;  %2376 = vmatprep.mubr.msk.f32.mxu0 %vm3304_vm10, %v4153_v34 }
0x1240   :  { %vm788_vm7 = vcmp.eq.s32.totalorder %v2294_v45, 1  ;;  %vm1457_vm8 = vcmp.eq.s32.totalorder %v2294_v45, 4  ;;  %vm1903_vm9 = vcmp.eq.s32.totalorder %v2294_v45, 6 }
0x1242   :  { %2873 = vmatpush1.bf16.msra.mxu1 %v3448_v28  ;;  %v4155_v28 = vld [vmem:[#allocation17_spill] sm:$0xff] }
0x1243   :  { %2875 = vmatprep.subr.bf16.mxu1 %v3454_v33  ;;  %v259_v33 = vadd.f32 %v4155_v28, %v3519_v12  ;;  %v2056_v28 = vsel %vm2055_vm6, 1, %v3302_v19 }
0x1246   :  { %2877 = vmatpush1.bf16.msra.mxu1 %v3464_v41 }
0x1247   :  { %2879 = vmatprep.subr.bf16.mxu1 %v3473_v50 }
0x124a   :  { %2881 = vmatpush1.bf16.msra.mxu1 %v3481_v57 }
0x124b   :  { %2883 = vmatprep.subr.bf16.mxu1 %v3486_v61 }
0x124e   :  { %2885 = vmatpush1.bf16.msra.mxu1 %v3500_v6 }
0x124f   :  { %2887 = vmatprep.subr.bf16.mxu1 %v3529_v26 }
0x1252   :  { %2889 = vmatpush1.bf16.msra.mxu1 %v3536_v31 }
0x1253   :  { %2891 = vmatprep.subr.bf16.mxu1 %v3548_v44 }
0x1256   :  { %2893 = vmatpush1.bf16.msra.mxu1 %v3551_v51 }
0x1257   :  { %2895 = vmatprep.subr.bf16.mxu1 %v3563_v63 }
0x125a   :  { %2897 = vmatpush1.bf16.msra.mxu1 %v3571_v22 }
0x1310   :  { %v1795_v41 = vpop.f32.mrb[12].mxu0  ;;  %v1866_v50 = vpop.f32.mrb[30].mxu1 }
0x1311   :  { %v1915_v57 = vadd.f32 %v1795_v41, %v257_v20  ;;  %v1797_v61 = vpop.f32.mrb[13].mxu0  ;;  %v1868_v6 = vpop.f32.mrb[31].mxu1  ;;  %v1871_v22 = vadd.f32 %v1866_v50, %v3678_v36  ;;  %v1235_v20 = vsel %vm1234_vm4, 1, %v3302_v19 }
0x1312   :  { %v1916_v26 = vadd.f32 %v1797_v61, %v259_v33  ;;  %v1872_v31 = vadd.f32 %v1868_v6, %v3669_v4 }
0x1313   :  { %v2325_v63 = vmul.f32 -1.442695, %v1915_v57  ;;  %v2323_v12 = vmul.f32 -1.442695, %v1871_v22  ;;  %v2064_v22 = vld [vmem:[#allocation8 + $0x10] sm:$0xff] }
0x1314   :  { %3136 = vtanh.f32 %v1916_v26  ;;  %v2324_v53 = vmul.f32 -1.442695, %v1872_v31 }
0x1315   :  { %3138 = vtanh.f32 %v1872_v31  ;;  %v789_v31 = vsel %vm788_vm7, 1, %v3302_v19 }
0x1316   :  { %3140 = vpow2.f32 %v2325_v63  ;;  %v2063_v63 = vld [vmem:[#allocation8 + $0x8] sm:$0xff] }
0x1317   :  { %3142 = vpow2.f32 %v2323_v12  ;;  %v3303_v12 = vmov 0.0|0.0  }
0x1318   :  { %2898 = vmatprep.subr.bf16.mxu0 %v3303_v12 }
0x131e   :  { %v3137_v44 = vpop.eup %3136 }
0x131f   :  { %1932 = vrot.lane.b32.xlu1 %v3137_v44, %s3301_s0  ;;  %v3139_v51 = vpop.eup %3138  ;;  %v1458_v44 = vsel %vm1457_vm8, 1, %v3302_v19 }
0x1320   :  { %1888 = vrot.lane.b32.xlu0 %v3139_v51, %s3301_s0  ;;  %v3141_v29 = vpop.eup %3140  ;;  %v1904_v51 = vsel %vm1903_vm9, 1, %v3302_v19 }
0x1321   :  { %v1923_v2 = vadd.f32 1.0, %v3141_v29  ;;  %v3143_v5 = vpop.eup %3142 }
0x1322   :  { %v1879_v17 = vadd.f32 1.0, %v3143_v5 }
0x1323   :  { %3144 = vrcp.f32 %v1923_v2  ;;  %v2065_v2 = vld [vmem:[#allocation8 + $0x18] sm:$0xff] }
0x1324   :  { %3146 = vrcp.f32 %v1879_v17  ;;  %v2902_v5 = vpack.c.bf16 %v2065_v2, %v2064_v22  ;;  %v2066_v17 = vld [vmem:[#allocation8 + $0x20] sm:$0xff] }
0x1325   :  { %v2331_v22 = vld [vmem:[%s4142_s8] ss:$0 sm:$0xff] }
0x1326   :  { %v2332_v2 = vld [vmem:[#allocation9] ss:$0 sm:$0xff] }
0x132d   :  { %v3145_v38 = vpop.eup %3144 }
0x132e   :  { %v3147_v55 = vpop.eup %3146  ;;  %v1930_v23 = vmul.f32 %v3145_v38, %v3976_v43 }
0x132f   :  { %v1886_v60 = vmul.f32 %v3147_v55, %v3980_v40  ;;  %v2326_v40 = vmul.f32 -1.442695, %v1916_v26 }
0x1391   :  { %v1933_v11 = vpop.permute.xlu1 %1932 }
0x1392   :  { %v1935_v39 = vmul.f32 %v3145_v38, %v1933_v11  ;;  %v1889_v56 = vpop.permute.xlu0 %1888  ;;  %v2067_v38 = vld [vmem:[#allocation8 + $0x28] sm:$0xff] }
0x1393   :  { %v1891_v7 = vmul.f32 %v3147_v55, %v1889_v56  ;;  %v2905_v11 = vpack.c.bf16 %v2067_v38, %v2066_v17  ;;  %v2069_v55 = vld [vmem:[#allocation8 + $0x38] sm:$0xff] }
0x1394   :  { %1937 = vrot.lane.b32.xlu1 %v1935_v39, %s3301_s0  ;;  %v2068_v39 = vld [vmem:[#allocation8 + $0x30] sm:$0xff] }
0x1395   :  { %1893 = vrot.lane.b32.xlu0 %v1891_v7, %s3301_s0  ;;  %v2908_v7 = vpack.c.bf16 %v2069_v55, %v2068_v39 }
0x1406   :  { %v1938_v14 = vpop.permute.xlu1 %1937 }
0x1407   :  { %v1940_v18 = vadd.f32 %v1938_v14, %v1930_v23  ;;  %v1894_v52 = vpop.permute.xlu0 %1893 }
0x1408   :  { %v4018_v21 = vadd.f32 %v1894_v52, %v1886_v60 }
0x1409   :  { %3148 = vtanh.f32 %v1940_v18 }
0x140a   :  { %3150 = vtanh.f32 %v4018_v21 }
0x140b   :  { %3152 = vpow2.f32 %v2324_v53 }
0x1413   :  { %v3149_v48 = vpop.eup %3148 }
0x1414   :  { %1943 = vrot.lane.b32.xlu1 %v3149_v48, %s3301_s0  ;;  %v3151_v47 = vpop.eup %3150 }
0x1415   :  { %1899 = vrot.lane.b32.xlu0 %v3151_v47, %s3301_s0  ;;  %v3153_v10 = vpop.eup %3152 }
0x1416   :  { %v1880_v54 = vadd.f32 1.0, %v3153_v10  ;;  %v4156_v10 = vld [vmem:[#allocation18_spill] sm:$0xff] }
0x1418   :  { %3154 = vrcp.f32 %v1880_v54 }
0x1419   :  { %3156 = vpow2.f32 %v2326_v40 }
0x1422   :  { %v3155_v43 = vpop.eup %3154 }
0x1423   :  { %v3157_v13 = vpop.eup %3156 }
0x1424   :  { %v1924_v59 = vadd.f32 1.0, %v3157_v13 }
0x1426   :  { %3158 = vrcp.f32 %v1924_v59 }
0x1430   :  { %v3159_v25 = vpop.eup %3158 }
0x1486   :  { %v1944_v30 = vpop.permute.xlu1 %1943 }
0x1487   :  { %v1900_v0 = vpop.permute.xlu0 %1899  ;;  %v1946_v62 = vmul.f32 %v3159_v25, %v1944_v30 }
0x1488   :  { %v4023_v35 = vmul.f32 %v3155_v43, %v1900_v0 }
0x148a   :  { %1948 = vrot.lane.b32.xlu0 %v4023_v35, %s3301_s0 }
0x14fc   :  { %v1949_v46 = vpop.permute.xlu0 %1948 }
0x14fd   :  { %v1951_v3 = vsel %vm321_vm1, %v1946_v62, %v1949_v46  ;;  %v2167_v46 = vld [vmem:[%s4144_s10] sm:$0xff] }
0x14fe   :  { %2017 = vmatmul.mubr.f32.vlgmr.msra.gmra.mrb[32].mxu1 %v1951_v3 }
0x15d1   :  { %v2018_v16 = vpop.f32.mrb[32].mxu1 }
0x15d2   :  { %v2020_v24 = vpop.f32.mrb[33].mxu1  ;;  %v2023_v33 = vadd.f32 %v2018_v16, %v3678_v36  ;;  %v2062_v36 = vld [vmem:[#allocation8] sm:$0xff] }
0x15d3   :  { %v4029_v32 = vadd.f32 %v2020_v24, %v3669_v4  ;;  %v1681_v4 = vsel %vm1680_vm5, 1, %v3302_v19  ;;  %v2899_v29 = vpack.c.bf16 %v2063_v63, %v2062_v36  ;;  %v2329_v36 = vld [vmem:[%s4141_s7] ss:$0 sm:$0xff]  ;;  %s3260_s7 = scalar_lea.vmem %s2268_s4, 128 }
0x15d4   :  { %v2327_v41 = vmul.f32 -1.442695, %v2023_v33  ;;  %p3261_p4 = scmp.ne.s32.totalorder %s2268_s4, %s3260_s7  ;;  %p3266_p6 = scmp.lt.s32.totalorder %s3260_s7, %s3260_s7 }
0x15d5   :  { %3160 = vtanh.f32 %v4029_v32  ;;  %2900 = vmatpush3.bf16.msra.mxu0 %v2899_v29  ;;  %v2328_v60 = vmul.f32 -1.442695, %v4029_v32 }
0x15d6   :  { %3162 = vpow2.f32 %v2327_v41  ;;  %2901 = vmatprep.subr.bf16.mxu0 %v3303_v12  ;;  %v2177_v41 = vld [vmem:[%s4144_s10 + $0x50] sm:$0xff]  ;;  %p3267_p7 = por %p3266_p6, %p3265_p5 }
0x15d8   :  { %p3268_p8 = pnand %p3267_p7, %p3261_p4 }
0x15d9   :  { %2903 = vmatpush3.bf16.msra.mxu0 %v2902_v5 }
0x15da   :  { %2904 = vmatprep.subr.bf16.mxu0 %v3303_v12 }
0x15dd   :  { %2906 = vmatpush3.bf16.msra.mxu0 %v2905_v11  ;;  %v2333_v11 = vld [vmem:[%s4145_s11] ss:$0 sm:$0xff] }
0x15de   :  { %2907 = vmatprep.subr.bf16.mxu0 %v3303_v12 }
0x15df   :  { %v3161_v49 = vpop.eup %3160 }
0x15e0   :  { %2040 = vrot.lane.b32.xlu1 %v3161_v49, %s3301_s0  ;;  %v3163_v50 = vpop.eup %3162 }
0x15e1   :  { %v2031_v57 = vadd.f32 1.0, %v3163_v50  ;;  %2909 = vmatpush3.bf16.msra.mxu0 %v2908_v7  ;;  %v2178_v50 = vld [vmem:[%s4144_s10 + $0x58] sm:$0xff] }
0x15e2   :  { %2910 = vmatprep.subr.bf16.mxu0 %v3303_v12 }
0x15e3   :  { %3164 = vrcp.f32 %v2031_v57  ;;  %v2926_v57 = vpack.c.bf16 %v2178_v50, %v2177_v41 }
0x15e4   :  { %564 = vperm.xlu1 %2978, %v562_v58  }
0x15e8   :  { %1014 = vperm.xlu1 %2978, %v1012_v15   ;;  %v2173_v15 = vld [vmem:[%s4144_s10 + $0x30] sm:$0xff] }
0x15ec   :  { %1237 = vperm.xlu1 %2978, %v1235_v20  }
0x15ed   :  { %v3165_v61 = vpop.eup %3164 }
0x15ee   :  { %v2038_v56 = vmul.f32 %v3165_v61, %v4018_v21 }
0x15f0   :  { %1683 = vperm.xlu1 %2978, %v1681_v4   ;;  %v2175_v4 = vld [vmem:[%s4144_s10 + $0x40] sm:$0xff] }
0x15f4   :  { %2058 = vperm.xlu1 %2978, %v2056_v28   ;;  %v2176_v28 = vld [vmem:[%s4144_s10 + $0x48] sm:$0xff] }
0x15f5   :  { %v2923_v33 = vpack.c.bf16 %v2176_v28, %v2175_v4 }
0x1652   :  { %v2041_v6 = vpop.permute.xlu1 %2040 }
0x1653   :  { %v2043_v26 = vmul.f32 %v3165_v61, %v2041_v6  ;;  %v2179_v61 = vld [vmem:[%s4144_s10 + $0x60] sm:$0xff]  ;;  %v2180_v6 = vld [vmem:[%s4144_s10 + $0x68] sm:$0xff] }
0x1655   :  { %2045 = vrot.lane.b32.xlu0 %v2043_v26, %s3301_s0  ;;  %v2929_v26 = vpack.c.bf16 %v2180_v6, %v2179_v61 }
0x1659   :  { %791 = vperm.xlu0 %2979, %v789_v31   ;;  %v2181_v31 = vld [vmem:[%s4144_s10 + $0x70] sm:$0xff] }
0x165d   :  { %1460 = vperm.xlu0 %2979, %v1458_v44   ;;  %v2182_v44 = vld [vmem:[%s4144_s10 + $0x78] sm:$0xff] }
0x1661   :  { %1906 = vperm.xlu0 %2979, %v1904_v51   ;;  %v2932_v51 = vpack.c.bf16 %v2182_v44, %v2181_v31 }
0x1663   :  { %v565_v52 = vpop.permute.xlu1 %564 }
0x1664   :  { %vm566_vm11 = vcmp.eq.s32.totalorder %v565_v52, 1 }
0x1665   :  { %v567_v54 = vsel %vm566_vm11, %v4156_v10, 0.0 }
0x1667   :  { %v1015_v21 = vpop.permute.xlu1 %1014 }
0x1668   :  { %vm1016_vm13 = vcmp.eq.s32.totalorder %v1015_v21, 1 }
0x166b   :  { %v1238_v0 = vpop.permute.xlu1 %1237 }
0x166c   :  { %vm1239_vm14 = vcmp.eq.s32.totalorder %v1238_v0, 1 }
0x166f   :  { %v1684_v30 = vpop.permute.xlu1 %1683 }
0x1670   :  { %vm1685_vm0 = vcmp.eq.s32.totalorder %v1684_v30, 1 }
0x1673   :  { %v2059_v3 = vpop.permute.xlu1 %2058 }
0x1674   :  { %vm2060_vm3 = vcmp.eq.s32.totalorder %v2059_v3, 1 }
0x16c7   :  { %v2046_v23 = vpop.permute.xlu0 %2045 }
0x16c8   :  { %v2048_v14 = vadd.f32 %v2046_v23, %v2038_v56 }
0x16ca   :  { %3166 = vtanh.f32 %v2048_v14 }
0x16cb   :  { %3168 = vpow2.f32 %v2328_v60 }
0x16d4   :  { %v3167_v18 = vpop.eup %3166 }
0x16d5   :  { %2051 = vrot.lane.b32.xlu0 %v3167_v18, %s3301_s0  ;;  %v3169_v48 = vpop.eup %3168 }
0x16d6   :  { %v2032_v53 = vadd.f32 1.0, %v3169_v48 }
0x16d8   :  { %v792_v47 = vpop.permute.xlu0 %791  ;;  %3170 = vrcp.f32 %v2032_v53 }
0x16d9   :  { %vm793_vm12 = vcmp.eq.s32.totalorder %v792_v47, 1 }
0x16da   :  { %v794_v43 = vsel %vm793_vm12, %v3750_v27, %v567_v54  ;;  %v2168_v27 = vld [vmem:[%s4144_s10 + $0x8] sm:$0xff] }
0x16db   :  { %v1017_v13 = vsel %vm1016_vm13, %v3809_v8, %v794_v43  ;;  %v2911_v24 = vpack.c.bf16 %v2168_v27, %v2167_v46 }
0x16dc   :  { %v1461_v40 = vpop.permute.xlu0 %1460  ;;  %v1240_v59 = vsel %vm1239_vm14, %v3868_v1, %v1017_v13 }
0x16dd   :  { %vm1462_vm15 = vcmp.eq.s32.totalorder %v1461_v40, 1 }
0x16de   :  { %v1463_v62 = vsel %vm1462_vm15, %v3927_v42, %v1240_v59  ;;  %v2169_v42 = vld [vmem:[%s4144_s10 + $0x10] sm:$0xff] }
0x16df   :  { %v1686_v1 = vsel %vm1685_vm0, %v3985_v9, %v1463_v62  ;;  %v2914_v49 = vpack.c.bf16 %v2170_v37, %v2169_v42  ;;  %v2171_v9 = vld [vmem:[%s4144_s10 + $0x20] sm:$0xff] }
0x16e0   :  { %v1907_v25 = vpop.permute.xlu0 %1906 }
0x16e1   :  { %vm1908_vm2 = vcmp.eq.s32.totalorder %v1907_v25, 1 }
0x16e2   :  { %v3171_v8 = vpop.eup %3170  ;;  %v1909_v32 = vsel %vm1908_vm2, %v4023_v35, %v1686_v1  ;;  %v2172_v35 = vld [vmem:[%s4144_s10 + $0x28] sm:$0xff] }
0x16e3   :  { %v2917_v58 = vpack.c.bf16 %v2172_v35, %v2171_v9 }
0x1747   :  { %v2052_v19 = vpop.permute.xlu0 %2051 }
0x1748   :  { %v2054_v16 = vmul.f32 %v3171_v8, %v2052_v19 }
0x174a   :  { %v2061_v45 = vsel %vm2060_vm3, %v2054_v16, %v1909_v32 }
0x174b   :  { %2377 = vmatmul.mubr.msk.f32.vlgmr.msra.gmra.mrb[14].mxu0 %vm321_vm1, %v2061_v45 }
0x174c   :  { %2912 = vmatpush3.bf16.msra.mxu0 %v2911_v24  ;;  %2411 = vmatprep.mubr.msk.f32.mxu0 %vm3304_vm10, %v4153_v34  ;;  %v2174_v34 = vld [vmem:[%s4144_s10 + $0x38] sm:$0xff] }
0x174d   :  { %2913 = vmatprep.subr.bf16.mxu0 %v3303_v12  ;;  %v2920_v20 = vpack.c.bf16 %v2174_v34, %v2173_v15 }
0x1750   :  { %2915 = vmatpush3.bf16.msra.mxu0 %v2914_v49 }
0x1751   :  { %2916 = vmatprep.subr.bf16.mxu0 %v3303_v12 }
0x1754   :  { %2918 = vmatpush3.bf16.msra.mxu0 %v2917_v58 }
0x1755   :  { %2919 = vmatprep.subr.bf16.mxu0 %v3303_v12 }
0x1758   :  { %2921 = vmatpush3.bf16.msra.mxu0 %v2920_v20 }
0x1759   :  { %2922 = vmatprep.subr.bf16.mxu0 %v3303_v12 }
0x175c   :  { %2924 = vmatpush3.bf16.msra.mxu0 %v2923_v33 }
0x175d   :  { %2925 = vmatprep.subr.bf16.mxu0 %v3303_v12 }
0x1760   :  { %2927 = vmatpush3.bf16.msra.mxu0 %v2926_v57 }
0x1761   :  { %2928 = vmatprep.subr.bf16.mxu0 %v3303_v12 }
0x1764   :  { %2930 = vmatpush3.bf16.msra.mxu0 %v2929_v26 }
0x1765   :  { %2931 = vmatprep.subr.bf16.mxu0 %v3303_v12 }
0x1768   :  { %2933 = vmatpush3.bf16.msra.mxu0 %v2932_v51 }
0x181e   :  { %v2146_v63 = vpop.f32.mrb[14].mxu0 }
0x181f   :  { %v2147_v12 = vadd.f32 %v2329_v36, %v2146_v63  ;;  %v2378_v29 = vpop.f32.mrb[15].mxu0 }
0x1821   :  { %v2157_v5 = vmul.f32 %v2331_v22, %v2147_v12 }
0x1823   :  { %v2165_v17 = vadd.f32 %v2332_v2, %v2157_v5 }
0x1825   :  { %v2166_v38 = vmax.f32 %v2165_v17, 0.0 }
0x1827   :  { %2412 = vmatmul.mubr.f32.vlgmr.msra.gmra.mrb[16].mxu0 %v2166_v38 }
0x18fa   :  { %v2256_v39 = vpop.f32.mrb[16].mxu0 }
0x18fb   :  { %v2257_v55 = vadd.f32 %v2333_v11, %v2256_v39  ;;  %v2413_v56 = vpop.f32.mrb[17].mxu0 }
0x18fd   :  { %2260 = vst [vmem:[#allocation11] sm:$0xff] %v2257_v55 }
0x18fe   :  { %3271 = shalt.err (!%p3268_p8)
}
0x18ff   :  { %s3272_s28 = scalar_lea.hbm %s4146_s12, 128 }
0x1900   :  { %p3273_p9 = scmp.ne.s32.totalorder %s4146_s12, %s3272_s28  ;;  %p3276_p10 = scmp.lt.u32.totalorder %s3272_s28, %s4146_s12 }
0x1902   :  { %p3278_p11 = pnand %p3276_p10, %p3273_p9 }
0x1904   :  { %3281 = shalt.err (!%p3278_p11)
}
0x1905   :  { %2270 = dma.vmem_to_hbm [thread:$0]  %s2268_s4, 128, %s4146_s12, [#allocation5]  }
0x1906   :  { %3288 = dma.done.wait [#allocation5], 128  }
0x1907   :  { %3289 = vsyncadd [#allocation5], 4294967168 }
0x1908   :  { %2274 = vsyncpa [#allocation4], 1 }
0x1909   :  { %2275 = vsyncpa [#allocation7], 1 }
0x190a   :  { %2276 = vsyncpa [#allocation10], 1 }
0x190b   :  { %2277 = vsyncpa [#allocation5], 1 }

</bundles_post_ra>
